<compile_context>
chip_gen: v6e
topology: v6e:2x2x1
jax: 0.10.0
libtpu: 0.0.40
codegen_flags: <defaults>
</compile_context>

<pallas_src>
import jax
import jax.numpy as jnp
from jax.experimental import pallas as pl
from jax.experimental.pallas import tpu as pltpu

_BN_EPS = 1e-5
_LEAKY_SLOPE = 0.01      # nn.LeakyReLU() default negative_slope
_L1_EPS = 1e-6


# ----------------------------------------------------------------------------
# In-kernel helpers
# ----------------------------------------------------------------------------

def _leaky_relu(x):
    return jnp.where(x >= 0, x, _LEAKY_SLOPE * x)


def _bn_train(y, gamma, beta):
    """Training-mode BatchNorm2d on a (K, B*HW) activation map.

    Single pass: per-channel sum and sum-of-squares, biased variance
    var = E[x^2] - mean^2 (clamped at 0), eps=1e-5, affine gamma/beta.
    """
    inv_n = 1.0 / float(y.shape[1])
    s1 = jnp.sum(y, axis=1, keepdims=True)              # (K, 1)
    s2 = jnp.sum(y * y, axis=1, keepdims=True)          # (K, 1)
    mean = s1 * inv_n
    var = jnp.maximum(s2 * inv_n - mean * mean, 0.0)    # biased
    scale = gamma * jax.lax.rsqrt(var + _BN_EPS)
    shift = beta - mean * scale
    return y * scale + shift


# ----------------------------------------------------------------------------
# Fused kernel: SubspaceBlock + L1 norm + Gram/S + solve + apply
# ----------------------------------------------------------------------------

def subspace_fused_kernel(x_ref,
                          w0_ref, b0_ref, g0_ref, be0_ref,
                          w1_ref, b1_ref, g1_ref, be1_ref,
                          w2_ref, b2_ref, g2_ref, be2_ref,
                          o_ref):
    # x_ref : (B, C, HW)   flattened NCHW input
    # w0    : (K, C); w1, w2 : (K, K)      1x1 conv weights
    # b*/g*/be* : (K, 1)                   conv bias / BN gamma / BN beta
    # o_ref : (B, C, HW)   projected output
    f32 = jnp.float32
    B, C, HW = x_ref.shape
    K = w0_ref.shape[0]

    x_full = x_ref[...]                                        # (B, C, HW)
    # Fold batch onto the lane axis -> (C, B*HW): one matmul per conv,
    # one row-reduction per BN (stats over (B, H, W), exactly BatchNorm2d).
    xw = jnp.concatenate([x_full[b] for b in range(B)], axis=1)

    # conv0 -> bn0 -> LeakyReLU   (residual branch)
    y0 = jnp.dot(w0_ref[...], xw, preferred_element_type=f32) + b0_ref[...]
    res = _leaky_relu(_bn_train(y0, g0_ref[...], be0_ref[...]))

    # conv1 -> bn1 -> LeakyReLU
    y1 = jnp.dot(w1_ref[...], res, preferred_element_type=f32) + b1_ref[...]
    h1 = _leaky_relu(_bn_train(y1, g1_ref[...], be1_ref[...]))

    # conv2 -> bn2, then += residual   (no activation after the add)
    y2 = jnp.dot(w2_ref[...], h1, preferred_element_type=f32) + b2_ref[...]
    sub = _bn_train(y2, g2_ref[...], be2_ref[...]) + res       # (K, B*HW)

    row_idx = jax.lax.broadcasted_iota(jnp.int32, (K, 1), 0)

    # Per batch element (B is small & static; unrolled).
    for b in range(B):
        V = sub[:, b * HW:(b + 1) * HW]                        # (K, HW)
        xb = x_full[b]                                         # (C, HW)

        # L1-normalize basis rows.  EUP approx reciprocal: the projection is
        # exactly invariant to row scaling of Vn, so this cannot change the
        # result beyond fp rounding.
        l1 = jnp.sum(jnp.abs(V), axis=1, keepdims=True)        # (K, 1)
        Vn = V * pl.reciprocal(_L1_EPS + l1, approx=True)

        # One contraction over HW gives the augmented system
        #   aug = [ Gram | S ] = Vn @ [Vn ; X]^T : (K, K+C)
        stacked = jnp.concatenate([Vn, xb], axis=0)            # (K+C, HW)
        aug = jax.lax.dot_general(
            Vn, stacked, (((1,), (1,)), ((), ())),
            preferred_element_type=f32)                        # (K, K+C)

        # Unrolled Gauss-Jordan (K=16) on [Gram | S].  Gram is symmetric PSD,
        # so unpivoted elimination is stable; singular Gram would blow up the
        # reference's torch.inverse identically.  Result: [I | Gram^{-1} S].
        for kk in range(K):
            inv_p = 1.0 / aug[kk:kk + 1, kk:kk + 1]            # (1, 1)
            prow_n = aug[kk:kk + 1, :] * inv_p                 # (1, K+C)
            elim = aug - aug[:, kk:kk + 1] * prow_n
            aug = jnp.where(row_idx == kk, prow_n, elim)

        pf = aug[:, K:K + C]                                   # (K, C)

        # output_b = (V^T @ pf)^T = pf^T @ Vn : (C, HW), lane-dense store.
        o_ref[b] = jax.lax.dot_general(
            pf, Vn, (((0,), (0,)), ((), ())), preferred_element_type=f32)


# ----------------------------------------------------------------------------
# pallas_call wrapper (single fused dispatch, no grid)
# ----------------------------------------------------------------------------

_PARAM_ORDER = ("w0", "b0", "g0", "be0",
                "w1", "b1", "g1", "be1",
                "w2", "b2", "g2", "be2")


def subspace_forward(x, params):
    """Subspace.forward: x (B, C, H, W) NCHW -> (B, C, H, W)."""
    B, C, H, W = x.shape
    x_flat = x.reshape(B, C, H * W).astype(jnp.float32)   # contiguous reshape
    args = [x_flat] + [params[n].astype(jnp.float32) for n in _PARAM_ORDER]

    out = pl.pallas_call(
        subspace_fused_kernel,
        out_shape=jax.ShapeDtypeStruct((B, C, H * W), jnp.float32),
        in_specs=[pl.BlockSpec(memory_space=pltpu.MemorySpace.VMEM)
                  for _ in args],
        out_specs=pl.BlockSpec(memory_space=pltpu.MemorySpace.VMEM),
    )(*args)
    return out.reshape(B, C, H, W)


# ----------------------------------------------------------------------------
# Deterministic synthetic parameters + demo
# ----------------------------------------------------------------------------

def init_params(key, ch_in, k):
    ks = jax.random.split(key, 12)

    def w(kk, cout, cin):
        return jax.random.normal(kk, (cout, cin), jnp.float32) * (cin ** -0.5)

    def col(kk, scale):
        return scale * jax.random.normal(kk, (k, 1), jnp.float32)

    return {
        "w0": w(ks[0], k, ch_in), "b0": col(ks[1], 0.05),
        "g0": 1.0 + col(ks[2], 0.1), "be0": col(ks[3], 0.1),
        "w1": w(ks[4], k, k), "b1": col(ks[5], 0.05),
        "g1": 1.0 + col(ks[6], 0.1), "be1": col(ks[7], 0.1),
        "w2": w(ks[8], k, k), "b2": col(ks[9], 0.05),
        "g2": 1.0 + col(ks[10], 0.1), "be2": col(ks[11], 0.1),
    }


if __name__ == "__main__":
    key = jax.random.PRNGKey(0)
    k_param, k_x = jax.random.split(key)

    B, CH_IN, H, W = 2, 4, 16, 16
    K = 16                                  # Subspace default k=16

    params = init_params(k_param, CH_IN, K)
    x = jax.random.normal(k_x, (B, CH_IN, H, W), jnp.float32)

    fwd = jax.jit(subspace_forward)
    out = fwd(x, params)
    jax.block_until_ready(out)

    assert out.shape == (B, CH_IN, H, W)
    assert bool(jnp.all(jnp.isfinite(out)))
    print("KERNEL_OK")
</pallas_src>

<mosaic_0001>
module attributes {stable_mosaic.version = 11 : i64} {
  func.func @subspace_fused_kernel(%arg0: memref<2x4x256xf32, #tpu.memory_space<vmem>>, %arg1: memref<16x4xf32, #tpu.memory_space<vmem>>, %arg2: memref<16x1xf32, #tpu.memory_space<vmem>>, %arg3: memref<16x1xf32, #tpu.memory_space<vmem>>, %arg4: memref<16x1xf32, #tpu.memory_space<vmem>>, %arg5: memref<16x16xf32, #tpu.memory_space<vmem>>, %arg6: memref<16x1xf32, #tpu.memory_space<vmem>>, %arg7: memref<16x1xf32, #tpu.memory_space<vmem>>, %arg8: memref<16x1xf32, #tpu.memory_space<vmem>>, %arg9: memref<16x16xf32, #tpu.memory_space<vmem>>, %arg10: memref<16x1xf32, #tpu.memory_space<vmem>>, %arg11: memref<16x1xf32, #tpu.memory_space<vmem>>, %arg12: memref<16x1xf32, #tpu.memory_space<vmem>>, %arg13: memref<2x4x256xf32, #tpu.memory_space<vmem>>) attributes {dimension_semantics = [], scalar_prefetch = 0 : i64, scratch_operands = 0 : i64, tpu.core_type = #tpu.core_type<tc>} {
    %c0 = arith.constant 0 : index
    %c0_0 = arith.constant 0 : index
    %c0_1 = arith.constant 0 : index
    %0 = vector.load %arg0[%c0, %c0_0, %c0_1] : memref<2x4x256xf32, #tpu.memory_space<vmem>>, vector<2x4x256xf32>
    %1 = vector.extract_strided_slice %0 {offsets = [0, 0, 0], sizes = [1, 4, 256], strides = [1, 1, 1]} : vector<2x4x256xf32> to vector<1x4x256xf32>
    %2 = vector.shape_cast %1 : vector<1x4x256xf32> to vector<4x256xf32>
    %3 = vector.extract_strided_slice %0 {offsets = [1, 0, 0], sizes = [1, 4, 256], strides = [1, 1, 1]} : vector<2x4x256xf32> to vector<1x4x256xf32>
    %4 = vector.shape_cast %3 : vector<1x4x256xf32> to vector<4x256xf32>
    %5 = tpu.concatenate %2, %4 in 1 : vector<4x256xf32>, vector<4x256xf32> -> vector<4x512xf32>
    %c0_2 = arith.constant 0 : index
    %c0_3 = arith.constant 0 : index
    %6 = vector.load %arg1[%c0_2, %c0_3] : memref<16x4xf32, #tpu.memory_space<vmem>>, vector<16x4xf32>
    %cst = arith.constant dense<0.000000e+00> : vector<16x512xf32>
    %7 = tpu.matmul %6, %5, %cst {dimension_numbers = #tpu.dot_dimension_numbers<[1], [0], [0], [1], [0, 0, 1, 1], [], []>} : vector<16x4xf32>, vector<4x512xf32>, vector<16x512xf32> -> vector<16x512xf32>
    %c0_4 = arith.constant 0 : index
    %c0_5 = arith.constant 0 : index
    %8 = vector.load %arg2[%c0_4, %c0_5] : memref<16x1xf32, #tpu.memory_space<vmem>>, vector<16x1xf32>
    %9 = vector.broadcast %8 : vector<16x1xf32> to vector<16x512xf32>
    %10 = arith.addf %7, %9 : vector<16x512xf32>
    %c0_6 = arith.constant 0 : index
    %c0_7 = arith.constant 0 : index
    %11 = vector.load %arg3[%c0_6, %c0_7] : memref<16x1xf32, #tpu.memory_space<vmem>>, vector<16x1xf32>
    %c0_8 = arith.constant 0 : index
    %c0_9 = arith.constant 0 : index
    %12 = vector.load %arg4[%c0_8, %c0_9] : memref<16x1xf32, #tpu.memory_space<vmem>>, vector<16x1xf32>
    %cst_10 = arith.constant dense<0.000000e+00> : vector<16xf32>
    %13 = vector.multi_reduction <add>, %10, %cst_10 [1] : vector<16x512xf32> to vector<16xf32>
    %14 = vector.shape_cast %13 : vector<16xf32> to vector<16x1xf32>
    %15 = arith.mulf %10, %10 : vector<16x512xf32>
    %cst_11 = arith.constant dense<0.000000e+00> : vector<16xf32>
    %16 = vector.multi_reduction <add>, %15, %cst_11 [1] : vector<16x512xf32> to vector<16xf32>
    %17 = vector.shape_cast %16 : vector<16xf32> to vector<16x1xf32>
    %cst_12 = arith.constant 0.001953125 : f32
    %18 = vector.broadcast %cst_12 : f32 to vector<16x1xf32>
    %19 = arith.mulf %14, %18 : vector<16x1xf32>
    %cst_13 = arith.constant 0.001953125 : f32
    %20 = vector.broadcast %cst_13 : f32 to vector<16x1xf32>
    %21 = arith.mulf %17, %20 : vector<16x1xf32>
    %22 = arith.mulf %19, %19 : vector<16x1xf32>
    %23 = arith.subf %21, %22 : vector<16x1xf32>
    %cst_14 = arith.constant 0.000000e+00 : f32
    %24 = vector.broadcast %cst_14 : f32 to vector<16x1xf32>
    %25 = arith.maximumf %23, %24 : vector<16x1xf32>
    %cst_15 = arith.constant 9.99999974E-6 : f32
    %26 = vector.broadcast %cst_15 : f32 to vector<16x1xf32>
    %27 = arith.addf %25, %26 : vector<16x1xf32>
    %28 = math.rsqrt %27 : vector<16x1xf32>
    %29 = arith.mulf %11, %28 : vector<16x1xf32>
    %30 = arith.mulf %19, %29 : vector<16x1xf32>
    %31 = arith.subf %12, %30 : vector<16x1xf32>
    %32 = vector.broadcast %29 : vector<16x1xf32> to vector<16x512xf32>
    %33 = arith.mulf %10, %32 : vector<16x512xf32>
    %34 = vector.broadcast %31 : vector<16x1xf32> to vector<16x512xf32>
    %35 = arith.addf %33, %34 : vector<16x512xf32>
    %cst_16 = arith.constant 0.000000e+00 : f32
    %36 = vector.broadcast %cst_16 : f32 to vector<16x512xf32>
    %37 = arith.cmpf oge, %35, %36 : vector<16x512xf32>
    %cst_17 = arith.constant 0.00999999977 : f32
    %38 = vector.broadcast %cst_17 : f32 to vector<16x512xf32>
    %39 = arith.mulf %38, %35 : vector<16x512xf32>
    %40 = arith.select %37, %35, %39 : vector<16x512xi1>, vector<16x512xf32>
    %c0_18 = arith.constant 0 : index
    %c0_19 = arith.constant 0 : index
    %41 = vector.load %arg5[%c0_18, %c0_19] : memref<16x16xf32, #tpu.memory_space<vmem>>, vector<16x16xf32>
    %cst_20 = arith.constant dense<0.000000e+00> : vector<16x512xf32>
    %42 = tpu.matmul %41, %40, %cst_20 {dimension_numbers = #tpu.dot_dimension_numbers<[1], [0], [0], [1], [0, 0, 1, 1], [], []>} : vector<16x16xf32>, vector<16x512xf32>, vector<16x512xf32> -> vector<16x512xf32>
    %c0_21 = arith.constant 0 : index
    %c0_22 = arith.constant 0 : index
    %43 = vector.load %arg6[%c0_21, %c0_22] : memref<16x1xf32, #tpu.memory_space<vmem>>, vector<16x1xf32>
    %44 = vector.broadcast %43 : vector<16x1xf32> to vector<16x512xf32>
    %45 = arith.addf %42, %44 : vector<16x512xf32>
    %c0_23 = arith.constant 0 : index
    %c0_24 = arith.constant 0 : index
    %46 = vector.load %arg7[%c0_23, %c0_24] : memref<16x1xf32, #tpu.memory_space<vmem>>, vector<16x1xf32>
    %c0_25 = arith.constant 0 : index
    %c0_26 = arith.constant 0 : index
    %47 = vector.load %arg8[%c0_25, %c0_26] : memref<16x1xf32, #tpu.memory_space<vmem>>, vector<16x1xf32>
    %cst_27 = arith.constant dense<0.000000e+00> : vector<16xf32>
    %48 = vector.multi_reduction <add>, %45, %cst_27 [1] : vector<16x512xf32> to vector<16xf32>
    %49 = vector.shape_cast %48 : vector<16xf32> to vector<16x1xf32>
    %50 = arith.mulf %45, %45 : vector<16x512xf32>
    %cst_28 = arith.constant dense<0.000000e+00> : vector<16xf32>
    %51 = vector.multi_reduction <add>, %50, %cst_28 [1] : vector<16x512xf32> to vector<16xf32>
    %52 = vector.shape_cast %51 : vector<16xf32> to vector<16x1xf32>
    %cst_29 = arith.constant 0.001953125 : f32
    %53 = vector.broadcast %cst_29 : f32 to vector<16x1xf32>
    %54 = arith.mulf %49, %53 : vector<16x1xf32>
    %cst_30 = arith.constant 0.001953125 : f32
    %55 = vector.broadcast %cst_30 : f32 to vector<16x1xf32>
    %56 = arith.mulf %52, %55 : vector<16x1xf32>
    %57 = arith.mulf %54, %54 : vector<16x1xf32>
    %58 = arith.subf %56, %57 : vector<16x1xf32>
    %cst_31 = arith.constant 0.000000e+00 : f32
    %59 = vector.broadcast %cst_31 : f32 to vector<16x1xf32>
    %60 = arith.maximumf %58, %59 : vector<16x1xf32>
    %cst_32 = arith.constant 9.99999974E-6 : f32
    %61 = vector.broadcast %cst_32 : f32 to vector<16x1xf32>
    %62 = arith.addf %60, %61 : vector<16x1xf32>
    %63 = math.rsqrt %62 : vector<16x1xf32>
    %64 = arith.mulf %46, %63 : vector<16x1xf32>
    %65 = arith.mulf %54, %64 : vector<16x1xf32>
    %66 = arith.subf %47, %65 : vector<16x1xf32>
    %67 = vector.broadcast %64 : vector<16x1xf32> to vector<16x512xf32>
    %68 = arith.mulf %45, %67 : vector<16x512xf32>
    %69 = vector.broadcast %66 : vector<16x1xf32> to vector<16x512xf32>
    %70 = arith.addf %68, %69 : vector<16x512xf32>
    %cst_33 = arith.constant 0.000000e+00 : f32
    %71 = vector.broadcast %cst_33 : f32 to vector<16x512xf32>
    %72 = arith.cmpf oge, %70, %71 : vector<16x512xf32>
    %cst_34 = arith.constant 0.00999999977 : f32
    %73 = vector.broadcast %cst_34 : f32 to vector<16x512xf32>
    %74 = arith.mulf %73, %70 : vector<16x512xf32>
    %75 = arith.select %72, %70, %74 : vector<16x512xi1>, vector<16x512xf32>
    %c0_35 = arith.constant 0 : index
    %c0_36 = arith.constant 0 : index
    %76 = vector.load %arg9[%c0_35, %c0_36] : memref<16x16xf32, #tpu.memory_space<vmem>>, vector<16x16xf32>
    %cst_37 = arith.constant dense<0.000000e+00> : vector<16x512xf32>
    %77 = tpu.matmul %76, %75, %cst_37 {dimension_numbers = #tpu.dot_dimension_numbers<[1], [0], [0], [1], [0, 0, 1, 1], [], []>} : vector<16x16xf32>, vector<16x512xf32>, vector<16x512xf32> -> vector<16x512xf32>
    %c0_38 = arith.constant 0 : index
    %c0_39 = arith.constant 0 : index
    %78 = vector.load %arg10[%c0_38, %c0_39] : memref<16x1xf32, #tpu.memory_space<vmem>>, vector<16x1xf32>
    %79 = vector.broadcast %78 : vector<16x1xf32> to vector<16x512xf32>
    %80 = arith.addf %77, %79 : vector<16x512xf32>
    %c0_40 = arith.constant 0 : index
    %c0_41 = arith.constant 0 : index
    %81 = vector.load %arg11[%c0_40, %c0_41] : memref<16x1xf32, #tpu.memory_space<vmem>>, vector<16x1xf32>
    %c0_42 = arith.constant 0 : index
    %c0_43 = arith.constant 0 : index
    %82 = vector.load %arg12[%c0_42, %c0_43] : memref<16x1xf32, #tpu.memory_space<vmem>>, vector<16x1xf32>
    %cst_44 = arith.constant dense<0.000000e+00> : vector<16xf32>
    %83 = vector.multi_reduction <add>, %80, %cst_44 [1] : vector<16x512xf32> to vector<16xf32>
    %84 = vector.shape_cast %83 : vector<16xf32> to vector<16x1xf32>
    %85 = arith.mulf %80, %80 : vector<16x512xf32>
    %cst_45 = arith.constant dense<0.000000e+00> : vector<16xf32>
    %86 = vector.multi_reduction <add>, %85, %cst_45 [1] : vector<16x512xf32> to vector<16xf32>
    %87 = vector.shape_cast %86 : vector<16xf32> to vector<16x1xf32>
    %cst_46 = arith.constant 0.001953125 : f32
    %88 = vector.broadcast %cst_46 : f32 to vector<16x1xf32>
    %89 = arith.mulf %84, %88 : vector<16x1xf32>
    %cst_47 = arith.constant 0.001953125 : f32
    %90 = vector.broadcast %cst_47 : f32 to vector<16x1xf32>
    %91 = arith.mulf %87, %90 : vector<16x1xf32>
    %92 = arith.mulf %89, %89 : vector<16x1xf32>
    %93 = arith.subf %91, %92 : vector<16x1xf32>
    %cst_48 = arith.constant 0.000000e+00 : f32
    %94 = vector.broadcast %cst_48 : f32 to vector<16x1xf32>
    %95 = arith.maximumf %93, %94 : vector<16x1xf32>
    %cst_49 = arith.constant 9.99999974E-6 : f32
    %96 = vector.broadcast %cst_49 : f32 to vector<16x1xf32>
    %97 = arith.addf %95, %96 : vector<16x1xf32>
    %98 = math.rsqrt %97 : vector<16x1xf32>
    %99 = arith.mulf %81, %98 : vector<16x1xf32>
    %100 = arith.mulf %89, %99 : vector<16x1xf32>
    %101 = arith.subf %82, %100 : vector<16x1xf32>
    %102 = vector.broadcast %99 : vector<16x1xf32> to vector<16x512xf32>
    %103 = arith.mulf %80, %102 : vector<16x512xf32>
    %104 = vector.broadcast %101 : vector<16x1xf32> to vector<16x512xf32>
    %105 = arith.addf %103, %104 : vector<16x512xf32>
    %106 = arith.addf %105, %40 : vector<16x512xf32>
    %107 = tpu.iota {dimensions = array<i32: 0>} : vector<16x1xi32>
    %108 = vector.extract_strided_slice %106 {offsets = [0, 0], sizes = [16, 256], strides = [1, 1]} : vector<16x512xf32> to vector<16x256xf32>
    %109 = vector.extract_strided_slice %0 {offsets = [0, 0, 0], sizes = [1, 4, 256], strides = [1, 1, 1]} : vector<2x4x256xf32> to vector<1x4x256xf32>
    %110 = vector.shape_cast %109 : vector<1x4x256xf32> to vector<4x256xf32>
    %111 = math.absf %108 : vector<16x256xf32>
    %cst_50 = arith.constant dense<0.000000e+00> : vector<16xf32>
    %112 = vector.multi_reduction <add>, %111, %cst_50 [1] : vector<16x256xf32> to vector<16xf32>
    %113 = vector.shape_cast %112 : vector<16xf32> to vector<16x1xf32>
    %cst_51 = arith.constant 9.99999997E-7 : f32
    %114 = vector.broadcast %cst_51 : f32 to vector<16x1xf32>
    %115 = arith.addf %114, %113 : vector<16x1xf32>
    %116 = tpu.reciprocal %115 {approx = true} : vector<16x1xf32> -> vector<16x1xf32>
    %117 = vector.broadcast %116 : vector<16x1xf32> to vector<16x256xf32>
    %118 = arith.mulf %108, %117 : vector<16x256xf32>
    %119 = tpu.concatenate %118, %110 in 0 : vector<16x256xf32>, vector<4x256xf32> -> vector<20x256xf32>
    %cst_52 = arith.constant dense<0.000000e+00> : vector<16x20xf32>
    %120 = tpu.matmul %118, %119, %cst_52 {dimension_numbers = #tpu.dot_dimension_numbers<[1], [1], [0], [0], [0, 0, 1, 0], [], []>} : vector<16x256xf32>, vector<20x256xf32>, vector<16x20xf32> -> vector<16x20xf32>
    %121 = vector.extract_strided_slice %120 {offsets = [0, 0], sizes = [1, 1], strides = [1, 1]} : vector<16x20xf32> to vector<1x1xf32>
    %cst_53 = arith.constant 1.000000e+00 : f32
    %122 = vector.broadcast %cst_53 : f32 to vector<1x1xf32>
    %123 = arith.divf %122, %121 : vector<1x1xf32>
    %124 = vector.extract_strided_slice %120 {offsets = [0, 0], sizes = [1, 20], strides = [1, 1]} : vector<16x20xf32> to vector<1x20xf32>
    %125 = vector.broadcast %123 : vector<1x1xf32> to vector<1x20xf32>
    %126 = arith.mulf %124, %125 : vector<1x20xf32>
    %127 = vector.extract_strided_slice %120 {offsets = [0, 0], sizes = [16, 1], strides = [1, 1]} : vector<16x20xf32> to vector<16x1xf32>
    %128 = vector.broadcast %127 : vector<16x1xf32> to vector<16x20xf32>
    %129 = vector.broadcast %126 : vector<1x20xf32> to vector<16x20xf32>
    %130 = arith.mulf %128, %129 : vector<16x20xf32>
    %131 = arith.subf %120, %130 : vector<16x20xf32>
    %c0_i32 = arith.constant 0 : i32
    %132 = vector.broadcast %c0_i32 : i32 to vector<16x1xi32>
    %133 = arith.cmpi eq, %107, %132 : vector<16x1xi32>
    %134 = vector.shape_cast %133 : vector<16x1xi1> to vector<16x1xi1>
    %135 = vector.broadcast %134 : vector<16x1xi1> to vector<16x20xi1>
    %136 = vector.shape_cast %126 : vector<1x20xf32> to vector<1x20xf32>
    %137 = vector.broadcast %136 : vector<1x20xf32> to vector<16x20xf32>
    %138 = arith.select %135, %137, %131 : vector<16x20xi1>, vector<16x20xf32>
    %139 = vector.extract_strided_slice %138 {offsets = [1, 1], sizes = [1, 1], strides = [1, 1]} : vector<16x20xf32> to vector<1x1xf32>
    %cst_54 = arith.constant 1.000000e+00 : f32
    %140 = vector.broadcast %cst_54 : f32 to vector<1x1xf32>
    %141 = arith.divf %140, %139 : vector<1x1xf32>
    %142 = vector.extract_strided_slice %138 {offsets = [1, 0], sizes = [1, 20], strides = [1, 1]} : vector<16x20xf32> to vector<1x20xf32>
    %143 = vector.broadcast %141 : vector<1x1xf32> to vector<1x20xf32>
    %144 = arith.mulf %142, %143 : vector<1x20xf32>
    %145 = vector.extract_strided_slice %138 {offsets = [0, 1], sizes = [16, 1], strides = [1, 1]} : vector<16x20xf32> to vector<16x1xf32>
    %146 = vector.broadcast %145 : vector<16x1xf32> to vector<16x20xf32>
    %147 = vector.broadcast %144 : vector<1x20xf32> to vector<16x20xf32>
    %148 = arith.mulf %146, %147 : vector<16x20xf32>
    %149 = arith.subf %138, %148 : vector<16x20xf32>
    %c1_i32 = arith.constant 1 : i32
    %150 = vector.broadcast %c1_i32 : i32 to vector<16x1xi32>
    %151 = arith.cmpi eq, %107, %150 : vector<16x1xi32>
    %152 = vector.shape_cast %151 : vector<16x1xi1> to vector<16x1xi1>
    %153 = vector.broadcast %152 : vector<16x1xi1> to vector<16x20xi1>
    %154 = vector.shape_cast %144 : vector<1x20xf32> to vector<1x20xf32>
    %155 = vector.broadcast %154 : vector<1x20xf32> to vector<16x20xf32>
    %156 = arith.select %153, %155, %149 : vector<16x20xi1>, vector<16x20xf32>
    %157 = vector.extract_strided_slice %156 {offsets = [2, 2], sizes = [1, 1], strides = [1, 1]} : vector<16x20xf32> to vector<1x1xf32>
    %cst_55 = arith.constant 1.000000e+00 : f32
    %158 = vector.broadcast %cst_55 : f32 to vector<1x1xf32>
    %159 = arith.divf %158, %157 : vector<1x1xf32>
    %160 = vector.extract_strided_slice %156 {offsets = [2, 0], sizes = [1, 20], strides = [1, 1]} : vector<16x20xf32> to vector<1x20xf32>
    %161 = vector.broadcast %159 : vector<1x1xf32> to vector<1x20xf32>
    %162 = arith.mulf %160, %161 : vector<1x20xf32>
    %163 = vector.extract_strided_slice %156 {offsets = [0, 2], sizes = [16, 1], strides = [1, 1]} : vector<16x20xf32> to vector<16x1xf32>
    %164 = vector.broadcast %163 : vector<16x1xf32> to vector<16x20xf32>
    %165 = vector.broadcast %162 : vector<1x20xf32> to vector<16x20xf32>
    %166 = arith.mulf %164, %165 : vector<16x20xf32>
    %167 = arith.subf %156, %166 : vector<16x20xf32>
    %c2_i32 = arith.constant 2 : i32
    %168 = vector.broadcast %c2_i32 : i32 to vector<16x1xi32>
    %169 = arith.cmpi eq, %107, %168 : vector<16x1xi32>
    %170 = vector.shape_cast %169 : vector<16x1xi1> to vector<16x1xi1>
    %171 = vector.broadcast %170 : vector<16x1xi1> to vector<16x20xi1>
    %172 = vector.shape_cast %162 : vector<1x20xf32> to vector<1x20xf32>
    %173 = vector.broadcast %172 : vector<1x20xf32> to vector<16x20xf32>
    %174 = arith.select %171, %173, %167 : vector<16x20xi1>, vector<16x20xf32>
    %175 = vector.extract_strided_slice %174 {offsets = [3, 3], sizes = [1, 1], strides = [1, 1]} : vector<16x20xf32> to vector<1x1xf32>
    %cst_56 = arith.constant 1.000000e+00 : f32
    %176 = vector.broadcast %cst_56 : f32 to vector<1x1xf32>
    %177 = arith.divf %176, %175 : vector<1x1xf32>
    %178 = vector.extract_strided_slice %174 {offsets = [3, 0], sizes = [1, 20], strides = [1, 1]} : vector<16x20xf32> to vector<1x20xf32>
    %179 = vector.broadcast %177 : vector<1x1xf32> to vector<1x20xf32>
    %180 = arith.mulf %178, %179 : vector<1x20xf32>
    %181 = vector.extract_strided_slice %174 {offsets = [0, 3], sizes = [16, 1], strides = [1, 1]} : vector<16x20xf32> to vector<16x1xf32>
    %182 = vector.broadcast %181 : vector<16x1xf32> to vector<16x20xf32>
    %183 = vector.broadcast %180 : vector<1x20xf32> to vector<16x20xf32>
    %184 = arith.mulf %182, %183 : vector<16x20xf32>
    %185 = arith.subf %174, %184 : vector<16x20xf32>
    %c3_i32 = arith.constant 3 : i32
    %186 = vector.broadcast %c3_i32 : i32 to vector<16x1xi32>
    %187 = arith.cmpi eq, %107, %186 : vector<16x1xi32>
    %188 = vector.shape_cast %187 : vector<16x1xi1> to vector<16x1xi1>
    %189 = vector.broadcast %188 : vector<16x1xi1> to vector<16x20xi1>
    %190 = vector.shape_cast %180 : vector<1x20xf32> to vector<1x20xf32>
    %191 = vector.broadcast %190 : vector<1x20xf32> to vector<16x20xf32>
    %192 = arith.select %189, %191, %185 : vector<16x20xi1>, vector<16x20xf32>
    %193 = vector.extract_strided_slice %192 {offsets = [4, 4], sizes = [1, 1], strides = [1, 1]} : vector<16x20xf32> to vector<1x1xf32>
    %cst_57 = arith.constant 1.000000e+00 : f32
    %194 = vector.broadcast %cst_57 : f32 to vector<1x1xf32>
    %195 = arith.divf %194, %193 : vector<1x1xf32>
    %196 = vector.extract_strided_slice %192 {offsets = [4, 0], sizes = [1, 20], strides = [1, 1]} : vector<16x20xf32> to vector<1x20xf32>
    %197 = vector.broadcast %195 : vector<1x1xf32> to vector<1x20xf32>
    %198 = arith.mulf %196, %197 : vector<1x20xf32>
    %199 = vector.extract_strided_slice %192 {offsets = [0, 4], sizes = [16, 1], strides = [1, 1]} : vector<16x20xf32> to vector<16x1xf32>
    %200 = vector.broadcast %199 : vector<16x1xf32> to vector<16x20xf32>
    %201 = vector.broadcast %198 : vector<1x20xf32> to vector<16x20xf32>
    %202 = arith.mulf %200, %201 : vector<16x20xf32>
    %203 = arith.subf %192, %202 : vector<16x20xf32>
    %c4_i32 = arith.constant 4 : i32
    %204 = vector.broadcast %c4_i32 : i32 to vector<16x1xi32>
    %205 = arith.cmpi eq, %107, %204 : vector<16x1xi32>
    %206 = vector.shape_cast %205 : vector<16x1xi1> to vector<16x1xi1>
    %207 = vector.broadcast %206 : vector<16x1xi1> to vector<16x20xi1>
    %208 = vector.shape_cast %198 : vector<1x20xf32> to vector<1x20xf32>
    %209 = vector.broadcast %208 : vector<1x20xf32> to vector<16x20xf32>
    %210 = arith.select %207, %209, %203 : vector<16x20xi1>, vector<16x20xf32>
    %211 = vector.extract_strided_slice %210 {offsets = [5, 5], sizes = [1, 1], strides = [1, 1]} : vector<16x20xf32> to vector<1x1xf32>
    %cst_58 = arith.constant 1.000000e+00 : f32
    %212 = vector.broadcast %cst_58 : f32 to vector<1x1xf32>
    %213 = arith.divf %212, %211 : vector<1x1xf32>
    %214 = vector.extract_strided_slice %210 {offsets = [5, 0], sizes = [1, 20], strides = [1, 1]} : vector<16x20xf32> to vector<1x20xf32>
    %215 = vector.broadcast %213 : vector<1x1xf32> to vector<1x20xf32>
    %216 = arith.mulf %214, %215 : vector<1x20xf32>
    %217 = vector.extract_strided_slice %210 {offsets = [0, 5], sizes = [16, 1], strides = [1, 1]} : vector<16x20xf32> to vector<16x1xf32>
    %218 = vector.broadcast %217 : vector<16x1xf32> to vector<16x20xf32>
    %219 = vector.broadcast %216 : vector<1x20xf32> to vector<16x20xf32>
    %220 = arith.mulf %218, %219 : vector<16x20xf32>
    %221 = arith.subf %210, %220 : vector<16x20xf32>
    %c5_i32 = arith.constant 5 : i32
    %222 = vector.broadcast %c5_i32 : i32 to vector<16x1xi32>
    %223 = arith.cmpi eq, %107, %222 : vector<16x1xi32>
    %224 = vector.shape_cast %223 : vector<16x1xi1> to vector<16x1xi1>
    %225 = vector.broadcast %224 : vector<16x1xi1> to vector<16x20xi1>
    %226 = vector.shape_cast %216 : vector<1x20xf32> to vector<1x20xf32>
    %227 = vector.broadcast %226 : vector<1x20xf32> to vector<16x20xf32>
    %228 = arith.select %225, %227, %221 : vector<16x20xi1>, vector<16x20xf32>
    %229 = vector.extract_strided_slice %228 {offsets = [6, 6], sizes = [1, 1], strides = [1, 1]} : vector<16x20xf32> to vector<1x1xf32>
    %cst_59 = arith.constant 1.000000e+00 : f32
    %230 = vector.broadcast %cst_59 : f32 to vector<1x1xf32>
    %231 = arith.divf %230, %229 : vector<1x1xf32>
    %232 = vector.extract_strided_slice %228 {offsets = [6, 0], sizes = [1, 20], strides = [1, 1]} : vector<16x20xf32> to vector<1x20xf32>
    %233 = vector.broadcast %231 : vector<1x1xf32> to vector<1x20xf32>
    %234 = arith.mulf %232, %233 : vector<1x20xf32>
    %235 = vector.extract_strided_slice %228 {offsets = [0, 6], sizes = [16, 1], strides = [1, 1]} : vector<16x20xf32> to vector<16x1xf32>
    %236 = vector.broadcast %235 : vector<16x1xf32> to vector<16x20xf32>
    %237 = vector.broadcast %234 : vector<1x20xf32> to vector<16x20xf32>
    %238 = arith.mulf %236, %237 : vector<16x20xf32>
    %239 = arith.subf %228, %238 : vector<16x20xf32>
    %c6_i32 = arith.constant 6 : i32
    %240 = vector.broadcast %c6_i32 : i32 to vector<16x1xi32>
    %241 = arith.cmpi eq, %107, %240 : vector<16x1xi32>
    %242 = vector.shape_cast %241 : vector<16x1xi1> to vector<16x1xi1>
    %243 = vector.broadcast %242 : vector<16x1xi1> to vector<16x20xi1>
    %244 = vector.shape_cast %234 : vector<1x20xf32> to vector<1x20xf32>
    %245 = vector.broadcast %244 : vector<1x20xf32> to vector<16x20xf32>
    %246 = arith.select %243, %245, %239 : vector<16x20xi1>, vector<16x20xf32>
    %247 = vector.extract_strided_slice %246 {offsets = [7, 7], sizes = [1, 1], strides = [1, 1]} : vector<16x20xf32> to vector<1x1xf32>
    %cst_60 = arith.constant 1.000000e+00 : f32
    %248 = vector.broadcast %cst_60 : f32 to vector<1x1xf32>
    %249 = arith.divf %248, %247 : vector<1x1xf32>
    %250 = vector.extract_strided_slice %246 {offsets = [7, 0], sizes = [1, 20], strides = [1, 1]} : vector<16x20xf32> to vector<1x20xf32>
    %251 = vector.broadcast %249 : vector<1x1xf32> to vector<1x20xf32>
    %252 = arith.mulf %250, %251 : vector<1x20xf32>
    %253 = vector.extract_strided_slice %246 {offsets = [0, 7], sizes = [16, 1], strides = [1, 1]} : vector<16x20xf32> to vector<16x1xf32>
    %254 = vector.broadcast %253 : vector<16x1xf32> to vector<16x20xf32>
    %255 = vector.broadcast %252 : vector<1x20xf32> to vector<16x20xf32>
    %256 = arith.mulf %254, %255 : vector<16x20xf32>
    %257 = arith.subf %246, %256 : vector<16x20xf32>
    %c7_i32 = arith.constant 7 : i32
    %258 = vector.broadcast %c7_i32 : i32 to vector<16x1xi32>
    %259 = arith.cmpi eq, %107, %258 : vector<16x1xi32>
    %260 = vector.shape_cast %259 : vector<16x1xi1> to vector<16x1xi1>
    %261 = vector.broadcast %260 : vector<16x1xi1> to vector<16x20xi1>
    %262 = vector.shape_cast %252 : vector<1x20xf32> to vector<1x20xf32>
    %263 = vector.broadcast %262 : vector<1x20xf32> to vector<16x20xf32>
    %264 = arith.select %261, %263, %257 : vector<16x20xi1>, vector<16x20xf32>
    %265 = vector.extract_strided_slice %264 {offsets = [8, 8], sizes = [1, 1], strides = [1, 1]} : vector<16x20xf32> to vector<1x1xf32>
    %cst_61 = arith.constant 1.000000e+00 : f32
    %266 = vector.broadcast %cst_61 : f32 to vector<1x1xf32>
    %267 = arith.divf %266, %265 : vector<1x1xf32>
    %268 = vector.extract_strided_slice %264 {offsets = [8, 0], sizes = [1, 20], strides = [1, 1]} : vector<16x20xf32> to vector<1x20xf32>
    %269 = vector.broadcast %267 : vector<1x1xf32> to vector<1x20xf32>
    %270 = arith.mulf %268, %269 : vector<1x20xf32>
    %271 = vector.extract_strided_slice %264 {offsets = [0, 8], sizes = [16, 1], strides = [1, 1]} : vector<16x20xf32> to vector<16x1xf32>
    %272 = vector.broadcast %271 : vector<16x1xf32> to vector<16x20xf32>
    %273 = vector.broadcast %270 : vector<1x20xf32> to vector<16x20xf32>
    %274 = arith.mulf %272, %273 : vector<16x20xf32>
    %275 = arith.subf %264, %274 : vector<16x20xf32>
    %c8_i32 = arith.constant 8 : i32
    %276 = vector.broadcast %c8_i32 : i32 to vector<16x1xi32>
    %277 = arith.cmpi eq, %107, %276 : vector<16x1xi32>
    %278 = vector.shape_cast %277 : vector<16x1xi1> to vector<16x1xi1>
    %279 = vector.broadcast %278 : vector<16x1xi1> to vector<16x20xi1>
    %280 = vector.shape_cast %270 : vector<1x20xf32> to vector<1x20xf32>
    %281 = vector.broadcast %280 : vector<1x20xf32> to vector<16x20xf32>
    %282 = arith.select %279, %281, %275 : vector<16x20xi1>, vector<16x20xf32>
    %283 = vector.extract_strided_slice %282 {offsets = [9, 9], sizes = [1, 1], strides = [1, 1]} : vector<16x20xf32> to vector<1x1xf32>
    %cst_62 = arith.constant 1.000000e+00 : f32
    %284 = vector.broadcast %cst_62 : f32 to vector<1x1xf32>
    %285 = arith.divf %284, %283 : vector<1x1xf32>
    %286 = vector.extract_strided_slice %282 {offsets = [9, 0], sizes = [1, 20], strides = [1, 1]} : vector<16x20xf32> to vector<1x20xf32>
    %287 = vector.broadcast %285 : vector<1x1xf32> to vector<1x20xf32>
    %288 = arith.mulf %286, %287 : vector<1x20xf32>
    %289 = vector.extract_strided_slice %282 {offsets = [0, 9], sizes = [16, 1], strides = [1, 1]} : vector<16x20xf32> to vector<16x1xf32>
    %290 = vector.broadcast %289 : vector<16x1xf32> to vector<16x20xf32>
    %291 = vector.broadcast %288 : vector<1x20xf32> to vector<16x20xf32>
    %292 = arith.mulf %290, %291 : vector<16x20xf32>
    %293 = arith.subf %282, %292 : vector<16x20xf32>
    %c9_i32 = arith.constant 9 : i32
    %294 = vector.broadcast %c9_i32 : i32 to vector<16x1xi32>
    %295 = arith.cmpi eq, %107, %294 : vector<16x1xi32>
    %296 = vector.shape_cast %295 : vector<16x1xi1> to vector<16x1xi1>
    %297 = vector.broadcast %296 : vector<16x1xi1> to vector<16x20xi1>
    %298 = vector.shape_cast %288 : vector<1x20xf32> to vector<1x20xf32>
    %299 = vector.broadcast %298 : vector<1x20xf32> to vector<16x20xf32>
    %300 = arith.select %297, %299, %293 : vector<16x20xi1>, vector<16x20xf32>
    %301 = vector.extract_strided_slice %300 {offsets = [10, 10], sizes = [1, 1], strides = [1, 1]} : vector<16x20xf32> to vector<1x1xf32>
    %cst_63 = arith.constant 1.000000e+00 : f32
    %302 = vector.broadcast %cst_63 : f32 to vector<1x1xf32>
    %303 = arith.divf %302, %301 : vector<1x1xf32>
    %304 = vector.extract_strided_slice %300 {offsets = [10, 0], sizes = [1, 20], strides = [1, 1]} : vector<16x20xf32> to vector<1x20xf32>
    %305 = vector.broadcast %303 : vector<1x1xf32> to vector<1x20xf32>
    %306 = arith.mulf %304, %305 : vector<1x20xf32>
    %307 = vector.extract_strided_slice %300 {offsets = [0, 10], sizes = [16, 1], strides = [1, 1]} : vector<16x20xf32> to vector<16x1xf32>
    %308 = vector.broadcast %307 : vector<16x1xf32> to vector<16x20xf32>
    %309 = vector.broadcast %306 : vector<1x20xf32> to vector<16x20xf32>
    %310 = arith.mulf %308, %309 : vector<16x20xf32>
    %311 = arith.subf %300, %310 : vector<16x20xf32>
    %c10_i32 = arith.constant 10 : i32
    %312 = vector.broadcast %c10_i32 : i32 to vector<16x1xi32>
    %313 = arith.cmpi eq, %107, %312 : vector<16x1xi32>
    %314 = vector.shape_cast %313 : vector<16x1xi1> to vector<16x1xi1>
    %315 = vector.broadcast %314 : vector<16x1xi1> to vector<16x20xi1>
    %316 = vector.shape_cast %306 : vector<1x20xf32> to vector<1x20xf32>
    %317 = vector.broadcast %316 : vector<1x20xf32> to vector<16x20xf32>
    %318 = arith.select %315, %317, %311 : vector<16x20xi1>, vector<16x20xf32>
    %319 = vector.extract_strided_slice %318 {offsets = [11, 11], sizes = [1, 1], strides = [1, 1]} : vector<16x20xf32> to vector<1x1xf32>
    %cst_64 = arith.constant 1.000000e+00 : f32
    %320 = vector.broadcast %cst_64 : f32 to vector<1x1xf32>
    %321 = arith.divf %320, %319 : vector<1x1xf32>
    %322 = vector.extract_strided_slice %318 {offsets = [11, 0], sizes = [1, 20], strides = [1, 1]} : vector<16x20xf32> to vector<1x20xf32>
    %323 = vector.broadcast %321 : vector<1x1xf32> to vector<1x20xf32>
    %324 = arith.mulf %322, %323 : vector<1x20xf32>
    %325 = vector.extract_strided_slice %318 {offsets = [0, 11], sizes = [16, 1], strides = [1, 1]} : vector<16x20xf32> to vector<16x1xf32>
    %326 = vector.broadcast %325 : vector<16x1xf32> to vector<16x20xf32>
    %327 = vector.broadcast %324 : vector<1x20xf32> to vector<16x20xf32>
    %328 = arith.mulf %326, %327 : vector<16x20xf32>
    %329 = arith.subf %318, %328 : vector<16x20xf32>
    %c11_i32 = arith.constant 11 : i32
    %330 = vector.broadcast %c11_i32 : i32 to vector<16x1xi32>
    %331 = arith.cmpi eq, %107, %330 : vector<16x1xi32>
    %332 = vector.shape_cast %331 : vector<16x1xi1> to vector<16x1xi1>
    %333 = vector.broadcast %332 : vector<16x1xi1> to vector<16x20xi1>
    %334 = vector.shape_cast %324 : vector<1x20xf32> to vector<1x20xf32>
    %335 = vector.broadcast %334 : vector<1x20xf32> to vector<16x20xf32>
    %336 = arith.select %333, %335, %329 : vector<16x20xi1>, vector<16x20xf32>
    %337 = vector.extract_strided_slice %336 {offsets = [12, 12], sizes = [1, 1], strides = [1, 1]} : vector<16x20xf32> to vector<1x1xf32>
    %cst_65 = arith.constant 1.000000e+00 : f32
    %338 = vector.broadcast %cst_65 : f32 to vector<1x1xf32>
    %339 = arith.divf %338, %337 : vector<1x1xf32>
    %340 = vector.extract_strided_slice %336 {offsets = [12, 0], sizes = [1, 20], strides = [1, 1]} : vector<16x20xf32> to vector<1x20xf32>
    %341 = vector.broadcast %339 : vector<1x1xf32> to vector<1x20xf32>
    %342 = arith.mulf %340, %341 : vector<1x20xf32>
    %343 = vector.extract_strided_slice %336 {offsets = [0, 12], sizes = [16, 1], strides = [1, 1]} : vector<16x20xf32> to vector<16x1xf32>
    %344 = vector.broadcast %343 : vector<16x1xf32> to vector<16x20xf32>
    %345 = vector.broadcast %342 : vector<1x20xf32> to vector<16x20xf32>
    %346 = arith.mulf %344, %345 : vector<16x20xf32>
    %347 = arith.subf %336, %346 : vector<16x20xf32>
    %c12_i32 = arith.constant 12 : i32
    %348 = vector.broadcast %c12_i32 : i32 to vector<16x1xi32>
    %349 = arith.cmpi eq, %107, %348 : vector<16x1xi32>
    %350 = vector.shape_cast %349 : vector<16x1xi1> to vector<16x1xi1>
    %351 = vector.broadcast %350 : vector<16x1xi1> to vector<16x20xi1>
    %352 = vector.shape_cast %342 : vector<1x20xf32> to vector<1x20xf32>
    %353 = vector.broadcast %352 : vector<1x20xf32> to vector<16x20xf32>
    %354 = arith.select %351, %353, %347 : vector<16x20xi1>, vector<16x20xf32>
    %355 = vector.extract_strided_slice %354 {offsets = [13, 13], sizes = [1, 1], strides = [1, 1]} : vector<16x20xf32> to vector<1x1xf32>
    %cst_66 = arith.constant 1.000000e+00 : f32
    %356 = vector.broadcast %cst_66 : f32 to vector<1x1xf32>
    %357 = arith.divf %356, %355 : vector<1x1xf32>
    %358 = vector.extract_strided_slice %354 {offsets = [13, 0], sizes = [1, 20], strides = [1, 1]} : vector<16x20xf32> to vector<1x20xf32>
    %359 = vector.broadcast %357 : vector<1x1xf32> to vector<1x20xf32>
    %360 = arith.mulf %358, %359 : vector<1x20xf32>
    %361 = vector.extract_strided_slice %354 {offsets = [0, 13], sizes = [16, 1], strides = [1, 1]} : vector<16x20xf32> to vector<16x1xf32>
    %362 = vector.broadcast %361 : vector<16x1xf32> to vector<16x20xf32>
    %363 = vector.broadcast %360 : vector<1x20xf32> to vector<16x20xf32>
    %364 = arith.mulf %362, %363 : vector<16x20xf32>
    %365 = arith.subf %354, %364 : vector<16x20xf32>
    %c13_i32 = arith.constant 13 : i32
    %366 = vector.broadcast %c13_i32 : i32 to vector<16x1xi32>
    %367 = arith.cmpi eq, %107, %366 : vector<16x1xi32>
    %368 = vector.shape_cast %367 : vector<16x1xi1> to vector<16x1xi1>
    %369 = vector.broadcast %368 : vector<16x1xi1> to vector<16x20xi1>
    %370 = vector.shape_cast %360 : vector<1x20xf32> to vector<1x20xf32>
    %371 = vector.broadcast %370 : vector<1x20xf32> to vector<16x20xf32>
    %372 = arith.select %369, %371, %365 : vector<16x20xi1>, vector<16x20xf32>
    %373 = vector.extract_strided_slice %372 {offsets = [14, 14], sizes = [1, 1], strides = [1, 1]} : vector<16x20xf32> to vector<1x1xf32>
    %cst_67 = arith.constant 1.000000e+00 : f32
    %374 = vector.broadcast %cst_67 : f32 to vector<1x1xf32>
    %375 = arith.divf %374, %373 : vector<1x1xf32>
    %376 = vector.extract_strided_slice %372 {offsets = [14, 0], sizes = [1, 20], strides = [1, 1]} : vector<16x20xf32> to vector<1x20xf32>
    %377 = vector.broadcast %375 : vector<1x1xf32> to vector<1x20xf32>
    %378 = arith.mulf %376, %377 : vector<1x20xf32>
    %379 = vector.extract_strided_slice %372 {offsets = [0, 14], sizes = [16, 1], strides = [1, 1]} : vector<16x20xf32> to vector<16x1xf32>
    %380 = vector.broadcast %379 : vector<16x1xf32> to vector<16x20xf32>
    %381 = vector.broadcast %378 : vector<1x20xf32> to vector<16x20xf32>
    %382 = arith.mulf %380, %381 : vector<16x20xf32>
    %383 = arith.subf %372, %382 : vector<16x20xf32>
    %c14_i32 = arith.constant 14 : i32
    %384 = vector.broadcast %c14_i32 : i32 to vector<16x1xi32>
    %385 = arith.cmpi eq, %107, %384 : vector<16x1xi32>
    %386 = vector.shape_cast %385 : vector<16x1xi1> to vector<16x1xi1>
    %387 = vector.broadcast %386 : vector<16x1xi1> to vector<16x20xi1>
    %388 = vector.shape_cast %378 : vector<1x20xf32> to vector<1x20xf32>
    %389 = vector.broadcast %388 : vector<1x20xf32> to vector<16x20xf32>
    %390 = arith.select %387, %389, %383 : vector<16x20xi1>, vector<16x20xf32>
    %391 = vector.extract_strided_slice %390 {offsets = [15, 15], sizes = [1, 1], strides = [1, 1]} : vector<16x20xf32> to vector<1x1xf32>
    %cst_68 = arith.constant 1.000000e+00 : f32
    %392 = vector.broadcast %cst_68 : f32 to vector<1x1xf32>
    %393 = arith.divf %392, %391 : vector<1x1xf32>
    %394 = vector.extract_strided_slice %390 {offsets = [15, 0], sizes = [1, 20], strides = [1, 1]} : vector<16x20xf32> to vector<1x20xf32>
    %395 = vector.broadcast %393 : vector<1x1xf32> to vector<1x20xf32>
    %396 = arith.mulf %394, %395 : vector<1x20xf32>
    %397 = vector.extract_strided_slice %390 {offsets = [0, 15], sizes = [16, 1], strides = [1, 1]} : vector<16x20xf32> to vector<16x1xf32>
    %398 = vector.broadcast %397 : vector<16x1xf32> to vector<16x20xf32>
    %399 = vector.broadcast %396 : vector<1x20xf32> to vector<16x20xf32>
    %400 = arith.mulf %398, %399 : vector<16x20xf32>
    %401 = arith.subf %390, %400 : vector<16x20xf32>
    %c15_i32 = arith.constant 15 : i32
    %402 = vector.broadcast %c15_i32 : i32 to vector<16x1xi32>
    %403 = arith.cmpi eq, %107, %402 : vector<16x1xi32>
    %404 = vector.shape_cast %403 : vector<16x1xi1> to vector<16x1xi1>
    %405 = vector.broadcast %404 : vector<16x1xi1> to vector<16x20xi1>
    %406 = vector.shape_cast %396 : vector<1x20xf32> to vector<1x20xf32>
    %407 = vector.broadcast %406 : vector<1x20xf32> to vector<16x20xf32>
    %408 = arith.select %405, %407, %401 : vector<16x20xi1>, vector<16x20xf32>
    %409 = vector.extract_strided_slice %408 {offsets = [0, 16], sizes = [16, 4], strides = [1, 1]} : vector<16x20xf32> to vector<16x4xf32>
    %cst_69 = arith.constant dense<0.000000e+00> : vector<4x256xf32>
    %410 = tpu.matmul %409, %118, %cst_69 {dimension_numbers = #tpu.dot_dimension_numbers<[0], [0], [1], [1], [0, 1, 1, 1], [], []>} : vector<16x4xf32>, vector<16x256xf32>, vector<4x256xf32> -> vector<4x256xf32>
    %c0_70 = arith.constant 0 : index
    %c0_71 = arith.constant 0 : index
    %c0_72 = arith.constant 0 : index
    %411 = vector.load %arg13[%c0_70, %c0_71, %c0_72] : memref<2x4x256xf32, #tpu.memory_space<vmem>>, vector<1x4x256xf32>
    %412 = vector.shape_cast %411 : vector<1x4x256xf32> to vector<4x256xf32>
    %413 = vector.shape_cast %410 : vector<4x256xf32> to vector<1x4x256xf32>
    tpu.vector_store %arg13[%c0_70, %c0_71, %c0_72], %413 {strides = array<i32>} : memref<2x4x256xf32, #tpu.memory_space<vmem>>, vector<1x4x256xf32>,
    %414 = vector.extract_strided_slice %106 {offsets = [0, 256], sizes = [16, 256], strides = [1, 1]} : vector<16x512xf32> to vector<16x256xf32>
    %415 = vector.extract_strided_slice %0 {offsets = [1, 0, 0], sizes = [1, 4, 256], strides = [1, 1, 1]} : vector<2x4x256xf32> to vector<1x4x256xf32>
    %416 = vector.shape_cast %415 : vector<1x4x256xf32> to vector<4x256xf32>
    %417 = math.absf %414 : vector<16x256xf32>
    %cst_73 = arith.constant dense<0.000000e+00> : vector<16xf32>
    %418 = vector.multi_reduction <add>, %417, %cst_73 [1] : vector<16x256xf32> to vector<16xf32>
    %419 = vector.shape_cast %418 : vector<16xf32> to vector<16x1xf32>
    %cst_74 = arith.constant 9.99999997E-7 : f32
    %420 = vector.broadcast %cst_74 : f32 to vector<16x1xf32>
    %421 = arith.addf %420, %419 : vector<16x1xf32>
    %422 = tpu.reciprocal %421 {approx = true} : vector<16x1xf32> -> vector<16x1xf32>
    %423 = vector.broadcast %422 : vector<16x1xf32> to vector<16x256xf32>
    %424 = arith.mulf %414, %423 : vector<16x256xf32>
    %425 = tpu.concatenate %424, %416 in 0 : vector<16x256xf32>, vector<4x256xf32> -> vector<20x256xf32>
    %cst_75 = arith.constant dense<0.000000e+00> : vector<16x20xf32>
    %426 = tpu.matmul %424, %425, %cst_75 {dimension_numbers = #tpu.dot_dimension_numbers<[1], [1], [0], [0], [0, 0, 1, 0], [], []>} : vector<16x256xf32>, vector<20x256xf32>, vector<16x20xf32> -> vector<16x20xf32>
    %427 = vector.extract_strided_slice %426 {offsets = [0, 0], sizes = [1, 1], strides = [1, 1]} : vector<16x20xf32> to vector<1x1xf32>
    %cst_76 = arith.constant 1.000000e+00 : f32
    %428 = vector.broadcast %cst_76 : f32 to vector<1x1xf32>
    %429 = arith.divf %428, %427 : vector<1x1xf32>
    %430 = vector.extract_strided_slice %426 {offsets = [0, 0], sizes = [1, 20], strides = [1, 1]} : vector<16x20xf32> to vector<1x20xf32>
    %431 = vector.broadcast %429 : vector<1x1xf32> to vector<1x20xf32>
    %432 = arith.mulf %430, %431 : vector<1x20xf32>
    %433 = vector.extract_strided_slice %426 {offsets = [0, 0], sizes = [16, 1], strides = [1, 1]} : vector<16x20xf32> to vector<16x1xf32>
    %434 = vector.broadcast %433 : vector<16x1xf32> to vector<16x20xf32>
    %435 = vector.broadcast %432 : vector<1x20xf32> to vector<16x20xf32>
    %436 = arith.mulf %434, %435 : vector<16x20xf32>
    %437 = arith.subf %426, %436 : vector<16x20xf32>
    %c0_i32_77 = arith.constant 0 : i32
    %438 = vector.broadcast %c0_i32_77 : i32 to vector<16x1xi32>
    %439 = arith.cmpi eq, %107, %438 : vector<16x1xi32>
    %440 = vector.shape_cast %439 : vector<16x1xi1> to vector<16x1xi1>
    %441 = vector.broadcast %440 : vector<16x1xi1> to vector<16x20xi1>
    %442 = vector.shape_cast %432 : vector<1x20xf32> to vector<1x20xf32>
    %443 = vector.broadcast %442 : vector<1x20xf32> to vector<16x20xf32>
    %444 = arith.select %441, %443, %437 : vector<16x20xi1>, vector<16x20xf32>
    %445 = vector.extract_strided_slice %444 {offsets = [1, 1], sizes = [1, 1], strides = [1, 1]} : vector<16x20xf32> to vector<1x1xf32>
    %cst_78 = arith.constant 1.000000e+00 : f32
    %446 = vector.broadcast %cst_78 : f32 to vector<1x1xf32>
    %447 = arith.divf %446, %445 : vector<1x1xf32>
    %448 = vector.extract_strided_slice %444 {offsets = [1, 0], sizes = [1, 20], strides = [1, 1]} : vector<16x20xf32> to vector<1x20xf32>
    %449 = vector.broadcast %447 : vector<1x1xf32> to vector<1x20xf32>
    %450 = arith.mulf %448, %449 : vector<1x20xf32>
    %451 = vector.extract_strided_slice %444 {offsets = [0, 1], sizes = [16, 1], strides = [1, 1]} : vector<16x20xf32> to vector<16x1xf32>
    %452 = vector.broadcast %451 : vector<16x1xf32> to vector<16x20xf32>
    %453 = vector.broadcast %450 : vector<1x20xf32> to vector<16x20xf32>
    %454 = arith.mulf %452, %453 : vector<16x20xf32>
    %455 = arith.subf %444, %454 : vector<16x20xf32>
    %c1_i32_79 = arith.constant 1 : i32
    %456 = vector.broadcast %c1_i32_79 : i32 to vector<16x1xi32>
    %457 = arith.cmpi eq, %107, %456 : vector<16x1xi32>
    %458 = vector.shape_cast %457 : vector<16x1xi1> to vector<16x1xi1>
    %459 = vector.broadcast %458 : vector<16x1xi1> to vector<16x20xi1>
    %460 = vector.shape_cast %450 : vector<1x20xf32> to vector<1x20xf32>
    %461 = vector.broadcast %460 : vector<1x20xf32> to vector<16x20xf32>
    %462 = arith.select %459, %461, %455 : vector<16x20xi1>, vector<16x20xf32>
    %463 = vector.extract_strided_slice %462 {offsets = [2, 2], sizes = [1, 1], strides = [1, 1]} : vector<16x20xf32> to vector<1x1xf32>
    %cst_80 = arith.constant 1.000000e+00 : f32
    %464 = vector.broadcast %cst_80 : f32 to vector<1x1xf32>
    %465 = arith.divf %464, %463 : vector<1x1xf32>
    %466 = vector.extract_strided_slice %462 {offsets = [2, 0], sizes = [1, 20], strides = [1, 1]} : vector<16x20xf32> to vector<1x20xf32>
    %467 = vector.broadcast %465 : vector<1x1xf32> to vector<1x20xf32>
    %468 = arith.mulf %466, %467 : vector<1x20xf32>
    %469 = vector.extract_strided_slice %462 {offsets = [0, 2], sizes = [16, 1], strides = [1, 1]} : vector<16x20xf32> to vector<16x1xf32>
    %470 = vector.broadcast %469 : vector<16x1xf32> to vector<16x20xf32>
    %471 = vector.broadcast %468 : vector<1x20xf32> to vector<16x20xf32>
    %472 = arith.mulf %470, %471 : vector<16x20xf32>
    %473 = arith.subf %462, %472 : vector<16x20xf32>
    %c2_i32_81 = arith.constant 2 : i32
    %474 = vector.broadcast %c2_i32_81 : i32 to vector<16x1xi32>
    %475 = arith.cmpi eq, %107, %474 : vector<16x1xi32>
    %476 = vector.shape_cast %475 : vector<16x1xi1> to vector<16x1xi1>
    %477 = vector.broadcast %476 : vector<16x1xi1> to vector<16x20xi1>
    %478 = vector.shape_cast %468 : vector<1x20xf32> to vector<1x20xf32>
    %479 = vector.broadcast %478 : vector<1x20xf32> to vector<16x20xf32>
    %480 = arith.select %477, %479, %473 : vector<16x20xi1>, vector<16x20xf32>
    %481 = vector.extract_strided_slice %480 {offsets = [3, 3], sizes = [1, 1], strides = [1, 1]} : vector<16x20xf32> to vector<1x1xf32>
    %cst_82 = arith.constant 1.000000e+00 : f32
    %482 = vector.broadcast %cst_82 : f32 to vector<1x1xf32>
    %483 = arith.divf %482, %481 : vector<1x1xf32>
    %484 = vector.extract_strided_slice %480 {offsets = [3, 0], sizes = [1, 20], strides = [1, 1]} : vector<16x20xf32> to vector<1x20xf32>
    %485 = vector.broadcast %483 : vector<1x1xf32> to vector<1x20xf32>
    %486 = arith.mulf %484, %485 : vector<1x20xf32>
    %487 = vector.extract_strided_slice %480 {offsets = [0, 3], sizes = [16, 1], strides = [1, 1]} : vector<16x20xf32> to vector<16x1xf32>
    %488 = vector.broadcast %487 : vector<16x1xf32> to vector<16x20xf32>
    %489 = vector.broadcast %486 : vector<1x20xf32> to vector<16x20xf32>
    %490 = arith.mulf %488, %489 : vector<16x20xf32>
    %491 = arith.subf %480, %490 : vector<16x20xf32>
    %c3_i32_83 = arith.constant 3 : i32
    %492 = vector.broadcast %c3_i32_83 : i32 to vector<16x1xi32>
    %493 = arith.cmpi eq, %107, %492 : vector<16x1xi32>
    %494 = vector.shape_cast %493 : vector<16x1xi1> to vector<16x1xi1>
    %495 = vector.broadcast %494 : vector<16x1xi1> to vector<16x20xi1>
    %496 = vector.shape_cast %486 : vector<1x20xf32> to vector<1x20xf32>
    %497 = vector.broadcast %496 : vector<1x20xf32> to vector<16x20xf32>
    %498 = arith.select %495, %497, %491 : vector<16x20xi1>, vector<16x20xf32>
    %499 = vector.extract_strided_slice %498 {offsets = [4, 4], sizes = [1, 1], strides = [1, 1]} : vector<16x20xf32> to vector<1x1xf32>
    %cst_84 = arith.constant 1.000000e+00 : f32
    %500 = vector.broadcast %cst_84 : f32 to vector<1x1xf32>
    %501 = arith.divf %500, %499 : vector<1x1xf32>
    %502 = vector.extract_strided_slice %498 {offsets = [4, 0], sizes = [1, 20], strides = [1, 1]} : vector<16x20xf32> to vector<1x20xf32>
    %503 = vector.broadcast %501 : vector<1x1xf32> to vector<1x20xf32>
    %504 = arith.mulf %502, %503 : vector<1x20xf32>
    %505 = vector.extract_strided_slice %498 {offsets = [0, 4], sizes = [16, 1], strides = [1, 1]} : vector<16x20xf32> to vector<16x1xf32>
    %506 = vector.broadcast %505 : vector<16x1xf32> to vector<16x20xf32>
    %507 = vector.broadcast %504 : vector<1x20xf32> to vector<16x20xf32>
    %508 = arith.mulf %506, %507 : vector<16x20xf32>
    %509 = arith.subf %498, %508 : vector<16x20xf32>
    %c4_i32_85 = arith.constant 4 : i32
    %510 = vector.broadcast %c4_i32_85 : i32 to vector<16x1xi32>
    %511 = arith.cmpi eq, %107, %510 : vector<16x1xi32>
    %512 = vector.shape_cast %511 : vector<16x1xi1> to vector<16x1xi1>
    %513 = vector.broadcast %512 : vector<16x1xi1> to vector<16x20xi1>
    %514 = vector.shape_cast %504 : vector<1x20xf32> to vector<1x20xf32>
    %515 = vector.broadcast %514 : vector<1x20xf32> to vector<16x20xf32>
    %516 = arith.select %513, %515, %509 : vector<16x20xi1>, vector<16x20xf32>
    %517 = vector.extract_strided_slice %516 {offsets = [5, 5], sizes = [1, 1], strides = [1, 1]} : vector<16x20xf32> to vector<1x1xf32>
    %cst_86 = arith.constant 1.000000e+00 : f32
    %518 = vector.broadcast %cst_86 : f32 to vector<1x1xf32>
    %519 = arith.divf %518, %517 : vector<1x1xf32>
    %520 = vector.extract_strided_slice %516 {offsets = [5, 0], sizes = [1, 20], strides = [1, 1]} : vector<16x20xf32> to vector<1x20xf32>
    %521 = vector.broadcast %519 : vector<1x1xf32> to vector<1x20xf32>
    %522 = arith.mulf %520, %521 : vector<1x20xf32>
    %523 = vector.extract_strided_slice %516 {offsets = [0, 5], sizes = [16, 1], strides = [1, 1]} : vector<16x20xf32> to vector<16x1xf32>
    %524 = vector.broadcast %523 : vector<16x1xf32> to vector<16x20xf32>
    %525 = vector.broadcast %522 : vector<1x20xf32> to vector<16x20xf32>
    %526 = arith.mulf %524, %525 : vector<16x20xf32>
    %527 = arith.subf %516, %526 : vector<16x20xf32>
    %c5_i32_87 = arith.constant 5 : i32
    %528 = vector.broadcast %c5_i32_87 : i32 to vector<16x1xi32>
    %529 = arith.cmpi eq, %107, %528 : vector<16x1xi32>
    %530 = vector.shape_cast %529 : vector<16x1xi1> to vector<16x1xi1>
    %531 = vector.broadcast %530 : vector<16x1xi1> to vector<16x20xi1>
    %532 = vector.shape_cast %522 : vector<1x20xf32> to vector<1x20xf32>
    %533 = vector.broadcast %532 : vector<1x20xf32> to vector<16x20xf32>
    %534 = arith.select %531, %533, %527 : vector<16x20xi1>, vector<16x20xf32>
    %535 = vector.extract_strided_slice %534 {offsets = [6, 6], sizes = [1, 1], strides = [1, 1]} : vector<16x20xf32> to vector<1x1xf32>
    %cst_88 = arith.constant 1.000000e+00 : f32
    %536 = vector.broadcast %cst_88 : f32 to vector<1x1xf32>
    %537 = arith.divf %536, %535 : vector<1x1xf32>
    %538 = vector.extract_strided_slice %534 {offsets = [6, 0], sizes = [1, 20], strides = [1, 1]} : vector<16x20xf32> to vector<1x20xf32>
    %539 = vector.broadcast %537 : vector<1x1xf32> to vector<1x20xf32>
    %540 = arith.mulf %538, %539 : vector<1x20xf32>
    %541 = vector.extract_strided_slice %534 {offsets = [0, 6], sizes = [16, 1], strides = [1, 1]} : vector<16x20xf32> to vector<16x1xf32>
    %542 = vector.broadcast %541 : vector<16x1xf32> to vector<16x20xf32>
    %543 = vector.broadcast %540 : vector<1x20xf32> to vector<16x20xf32>
    %544 = arith.mulf %542, %543 : vector<16x20xf32>
    %545 = arith.subf %534, %544 : vector<16x20xf32>
    %c6_i32_89 = arith.constant 6 : i32
    %546 = vector.broadcast %c6_i32_89 : i32 to vector<16x1xi32>
    %547 = arith.cmpi eq, %107, %546 : vector<16x1xi32>
    %548 = vector.shape_cast %547 : vector<16x1xi1> to vector<16x1xi1>
    %549 = vector.broadcast %548 : vector<16x1xi1> to vector<16x20xi1>
    %550 = vector.shape_cast %540 : vector<1x20xf32> to vector<1x20xf32>
    %551 = vector.broadcast %550 : vector<1x20xf32> to vector<16x20xf32>
    %552 = arith.select %549, %551, %545 : vector<16x20xi1>, vector<16x20xf32>
    %553 = vector.extract_strided_slice %552 {offsets = [7, 7], sizes = [1, 1], strides = [1, 1]} : vector<16x20xf32> to vector<1x1xf32>
    %cst_90 = arith.constant 1.000000e+00 : f32
    %554 = vector.broadcast %cst_90 : f32 to vector<1x1xf32>
    %555 = arith.divf %554, %553 : vector<1x1xf32>
    %556 = vector.extract_strided_slice %552 {offsets = [7, 0], sizes = [1, 20], strides = [1, 1]} : vector<16x20xf32> to vector<1x20xf32>
    %557 = vector.broadcast %555 : vector<1x1xf32> to vector<1x20xf32>
    %558 = arith.mulf %556, %557 : vector<1x20xf32>
    %559 = vector.extract_strided_slice %552 {offsets = [0, 7], sizes = [16, 1], strides = [1, 1]} : vector<16x20xf32> to vector<16x1xf32>
    %560 = vector.broadcast %559 : vector<16x1xf32> to vector<16x20xf32>
    %561 = vector.broadcast %558 : vector<1x20xf32> to vector<16x20xf32>
    %562 = arith.mulf %560, %561 : vector<16x20xf32>
    %563 = arith.subf %552, %562 : vector<16x20xf32>
    %c7_i32_91 = arith.constant 7 : i32
    %564 = vector.broadcast %c7_i32_91 : i32 to vector<16x1xi32>
    %565 = arith.cmpi eq, %107, %564 : vector<16x1xi32>
    %566 = vector.shape_cast %565 : vector<16x1xi1> to vector<16x1xi1>
    %567 = vector.broadcast %566 : vector<16x1xi1> to vector<16x20xi1>
    %568 = vector.shape_cast %558 : vector<1x20xf32> to vector<1x20xf32>
    %569 = vector.broadcast %568 : vector<1x20xf32> to vector<16x20xf32>
    %570 = arith.select %567, %569, %563 : vector<16x20xi1>, vector<16x20xf32>
    %571 = vector.extract_strided_slice %570 {offsets = [8, 8], sizes = [1, 1], strides = [1, 1]} : vector<16x20xf32> to vector<1x1xf32>
    %cst_92 = arith.constant 1.000000e+00 : f32
    %572 = vector.broadcast %cst_92 : f32 to vector<1x1xf32>
    %573 = arith.divf %572, %571 : vector<1x1xf32>
    %574 = vector.extract_strided_slice %570 {offsets = [8, 0], sizes = [1, 20], strides = [1, 1]} : vector<16x20xf32> to vector<1x20xf32>
    %575 = vector.broadcast %573 : vector<1x1xf32> to vector<1x20xf32>
    %576 = arith.mulf %574, %575 : vector<1x20xf32>
    %577 = vector.extract_strided_slice %570 {offsets = [0, 8], sizes = [16, 1], strides = [1, 1]} : vector<16x20xf32> to vector<16x1xf32>
    %578 = vector.broadcast %577 : vector<16x1xf32> to vector<16x20xf32>
    %579 = vector.broadcast %576 : vector<1x20xf32> to vector<16x20xf32>
    %580 = arith.mulf %578, %579 : vector<16x20xf32>
    %581 = arith.subf %570, %580 : vector<16x20xf32>
    %c8_i32_93 = arith.constant 8 : i32
    %582 = vector.broadcast %c8_i32_93 : i32 to vector<16x1xi32>
    %583 = arith.cmpi eq, %107, %582 : vector<16x1xi32>
    %584 = vector.shape_cast %583 : vector<16x1xi1> to vector<16x1xi1>
    %585 = vector.broadcast %584 : vector<16x1xi1> to vector<16x20xi1>
    %586 = vector.shape_cast %576 : vector<1x20xf32> to vector<1x20xf32>
    %587 = vector.broadcast %586 : vector<1x20xf32> to vector<16x20xf32>
    %588 = arith.select %585, %587, %581 : vector<16x20xi1>, vector<16x20xf32>
    %589 = vector.extract_strided_slice %588 {offsets = [9, 9], sizes = [1, 1], strides = [1, 1]} : vector<16x20xf32> to vector<1x1xf32>
    %cst_94 = arith.constant 1.000000e+00 : f32
    %590 = vector.broadcast %cst_94 : f32 to vector<1x1xf32>
    %591 = arith.divf %590, %589 : vector<1x1xf32>
    %592 = vector.extract_strided_slice %588 {offsets = [9, 0], sizes = [1, 20], strides = [1, 1]} : vector<16x20xf32> to vector<1x20xf32>
    %593 = vector.broadcast %591 : vector<1x1xf32> to vector<1x20xf32>
    %594 = arith.mulf %592, %593 : vector<1x20xf32>
    %595 = vector.extract_strided_slice %588 {offsets = [0, 9], sizes = [16, 1], strides = [1, 1]} : vector<16x20xf32> to vector<16x1xf32>
    %596 = vector.broadcast %595 : vector<16x1xf32> to vector<16x20xf32>
    %597 = vector.broadcast %594 : vector<1x20xf32> to vector<16x20xf32>
    %598 = arith.mulf %596, %597 : vector<16x20xf32>
    %599 = arith.subf %588, %598 : vector<16x20xf32>
    %c9_i32_95 = arith.constant 9 : i32
    %600 = vector.broadcast %c9_i32_95 : i32 to vector<16x1xi32>
    %601 = arith.cmpi eq, %107, %600 : vector<16x1xi32>
    %602 = vector.shape_cast %601 : vector<16x1xi1> to vector<16x1xi1>
    %603 = vector.broadcast %602 : vector<16x1xi1> to vector<16x20xi1>
    %604 = vector.shape_cast %594 : vector<1x20xf32> to vector<1x20xf32>
    %605 = vector.broadcast %604 : vector<1x20xf32> to vector<16x20xf32>
    %606 = arith.select %603, %605, %599 : vector<16x20xi1>, vector<16x20xf32>
    %607 = vector.extract_strided_slice %606 {offsets = [10, 10], sizes = [1, 1], strides = [1, 1]} : vector<16x20xf32> to vector<1x1xf32>
    %cst_96 = arith.constant 1.000000e+00 : f32
    %608 = vector.broadcast %cst_96 : f32 to vector<1x1xf32>
    %609 = arith.divf %608, %607 : vector<1x1xf32>
    %610 = vector.extract_strided_slice %606 {offsets = [10, 0], sizes = [1, 20], strides = [1, 1]} : vector<16x20xf32> to vector<1x20xf32>
    %611 = vector.broadcast %609 : vector<1x1xf32> to vector<1x20xf32>
    %612 = arith.mulf %610, %611 : vector<1x20xf32>
    %613 = vector.extract_strided_slice %606 {offsets = [0, 10], sizes = [16, 1], strides = [1, 1]} : vector<16x20xf32> to vector<16x1xf32>
    %614 = vector.broadcast %613 : vector<16x1xf32> to vector<16x20xf32>
    %615 = vector.broadcast %612 : vector<1x20xf32> to vector<16x20xf32>
    %616 = arith.mulf %614, %615 : vector<16x20xf32>
    %617 = arith.subf %606, %616 : vector<16x20xf32>
    %c10_i32_97 = arith.constant 10 : i32
    %618 = vector.broadcast %c10_i32_97 : i32 to vector<16x1xi32>
    %619 = arith.cmpi eq, %107, %618 : vector<16x1xi32>
    %620 = vector.shape_cast %619 : vector<16x1xi1> to vector<16x1xi1>
    %621 = vector.broadcast %620 : vector<16x1xi1> to vector<16x20xi1>
    %622 = vector.shape_cast %612 : vector<1x20xf32> to vector<1x20xf32>
    %623 = vector.broadcast %622 : vector<1x20xf32> to vector<16x20xf32>
    %624 = arith.select %621, %623, %617 : vector<16x20xi1>, vector<16x20xf32>
    %625 = vector.extract_strided_slice %624 {offsets = [11, 11], sizes = [1, 1], strides = [1, 1]} : vector<16x20xf32> to vector<1x1xf32>
    %cst_98 = arith.constant 1.000000e+00 : f32
    %626 = vector.broadcast %cst_98 : f32 to vector<1x1xf32>
    %627 = arith.divf %626, %625 : vector<1x1xf32>
    %628 = vector.extract_strided_slice %624 {offsets = [11, 0], sizes = [1, 20], strides = [1, 1]} : vector<16x20xf32> to vector<1x20xf32>
    %629 = vector.broadcast %627 : vector<1x1xf32> to vector<1x20xf32>
    %630 = arith.mulf %628, %629 : vector<1x20xf32>
    %631 = vector.extract_strided_slice %624 {offsets = [0, 11], sizes = [16, 1], strides = [1, 1]} : vector<16x20xf32> to vector<16x1xf32>
    %632 = vector.broadcast %631 : vector<16x1xf32> to vector<16x20xf32>
    %633 = vector.broadcast %630 : vector<1x20xf32> to vector<16x20xf32>
    %634 = arith.mulf %632, %633 : vector<16x20xf32>
    %635 = arith.subf %624, %634 : vector<16x20xf32>
    %c11_i32_99 = arith.constant 11 : i32
    %636 = vector.broadcast %c11_i32_99 : i32 to vector<16x1xi32>
    %637 = arith.cmpi eq, %107, %636 : vector<16x1xi32>
    %638 = vector.shape_cast %637 : vector<16x1xi1> to vector<16x1xi1>
    %639 = vector.broadcast %638 : vector<16x1xi1> to vector<16x20xi1>
    %640 = vector.shape_cast %630 : vector<1x20xf32> to vector<1x20xf32>
    %641 = vector.broadcast %640 : vector<1x20xf32> to vector<16x20xf32>
    %642 = arith.select %639, %641, %635 : vector<16x20xi1>, vector<16x20xf32>
    %643 = vector.extract_strided_slice %642 {offsets = [12, 12], sizes = [1, 1], strides = [1, 1]} : vector<16x20xf32> to vector<1x1xf32>
    %cst_100 = arith.constant 1.000000e+00 : f32
    %644 = vector.broadcast %cst_100 : f32 to vector<1x1xf32>
    %645 = arith.divf %644, %643 : vector<1x1xf32>
    %646 = vector.extract_strided_slice %642 {offsets = [12, 0], sizes = [1, 20], strides = [1, 1]} : vector<16x20xf32> to vector<1x20xf32>
    %647 = vector.broadcast %645 : vector<1x1xf32> to vector<1x20xf32>
    %648 = arith.mulf %646, %647 : vector<1x20xf32>
    %649 = vector.extract_strided_slice %642 {offsets = [0, 12], sizes = [16, 1], strides = [1, 1]} : vector<16x20xf32> to vector<16x1xf32>
    %650 = vector.broadcast %649 : vector<16x1xf32> to vector<16x20xf32>
    %651 = vector.broadcast %648 : vector<1x20xf32> to vector<16x20xf32>
    %652 = arith.mulf %650, %651 : vector<16x20xf32>
    %653 = arith.subf %642, %652 : vector<16x20xf32>
    %c12_i32_101 = arith.constant 12 : i32
    %654 = vector.broadcast %c12_i32_101 : i32 to vector<16x1xi32>
    %655 = arith.cmpi eq, %107, %654 : vector<16x1xi32>
    %656 = vector.shape_cast %655 : vector<16x1xi1> to vector<16x1xi1>
    %657 = vector.broadcast %656 : vector<16x1xi1> to vector<16x20xi1>
    %658 = vector.shape_cast %648 : vector<1x20xf32> to vector<1x20xf32>
    %659 = vector.broadcast %658 : vector<1x20xf32> to vector<16x20xf32>
    %660 = arith.select %657, %659, %653 : vector<16x20xi1>, vector<16x20xf32>
    %661 = vector.extract_strided_slice %660 {offsets = [13, 13], sizes = [1, 1], strides = [1, 1]} : vector<16x20xf32> to vector<1x1xf32>
    %cst_102 = arith.constant 1.000000e+00 : f32
    %662 = vector.broadcast %cst_102 : f32 to vector<1x1xf32>
    %663 = arith.divf %662, %661 : vector<1x1xf32>
    %664 = vector.extract_strided_slice %660 {offsets = [13, 0], sizes = [1, 20], strides = [1, 1]} : vector<16x20xf32> to vector<1x20xf32>
    %665 = vector.broadcast %663 : vector<1x1xf32> to vector<1x20xf32>
    %666 = arith.mulf %664, %665 : vector<1x20xf32>
    %667 = vector.extract_strided_slice %660 {offsets = [0, 13], sizes = [16, 1], strides = [1, 1]} : vector<16x20xf32> to vector<16x1xf32>
    %668 = vector.broadcast %667 : vector<16x1xf32> to vector<16x20xf32>
    %669 = vector.broadcast %666 : vector<1x20xf32> to vector<16x20xf32>
    %670 = arith.mulf %668, %669 : vector<16x20xf32>
    %671 = arith.subf %660, %670 : vector<16x20xf32>
    %c13_i32_103 = arith.constant 13 : i32
    %672 = vector.broadcast %c13_i32_103 : i32 to vector<16x1xi32>
    %673 = arith.cmpi eq, %107, %672 : vector<16x1xi32>
    %674 = vector.shape_cast %673 : vector<16x1xi1> to vector<16x1xi1>
    %675 = vector.broadcast %674 : vector<16x1xi1> to vector<16x20xi1>
    %676 = vector.shape_cast %666 : vector<1x20xf32> to vector<1x20xf32>
    %677 = vector.broadcast %676 : vector<1x20xf32> to vector<16x20xf32>
    %678 = arith.select %675, %677, %671 : vector<16x20xi1>, vector<16x20xf32>
    %679 = vector.extract_strided_slice %678 {offsets = [14, 14], sizes = [1, 1], strides = [1, 1]} : vector<16x20xf32> to vector<1x1xf32>
    %cst_104 = arith.constant 1.000000e+00 : f32
    %680 = vector.broadcast %cst_104 : f32 to vector<1x1xf32>
    %681 = arith.divf %680, %679 : vector<1x1xf32>
    %682 = vector.extract_strided_slice %678 {offsets = [14, 0], sizes = [1, 20], strides = [1, 1]} : vector<16x20xf32> to vector<1x20xf32>
    %683 = vector.broadcast %681 : vector<1x1xf32> to vector<1x20xf32>
    %684 = arith.mulf %682, %683 : vector<1x20xf32>
    %685 = vector.extract_strided_slice %678 {offsets = [0, 14], sizes = [16, 1], strides = [1, 1]} : vector<16x20xf32> to vector<16x1xf32>
    %686 = vector.broadcast %685 : vector<16x1xf32> to vector<16x20xf32>
    %687 = vector.broadcast %684 : vector<1x20xf32> to vector<16x20xf32>
    %688 = arith.mulf %686, %687 : vector<16x20xf32>
    %689 = arith.subf %678, %688 : vector<16x20xf32>
    %c14_i32_105 = arith.constant 14 : i32
    %690 = vector.broadcast %c14_i32_105 : i32 to vector<16x1xi32>
    %691 = arith.cmpi eq, %107, %690 : vector<16x1xi32>
    %692 = vector.shape_cast %691 : vector<16x1xi1> to vector<16x1xi1>
    %693 = vector.broadcast %692 : vector<16x1xi1> to vector<16x20xi1>
    %694 = vector.shape_cast %684 : vector<1x20xf32> to vector<1x20xf32>
    %695 = vector.broadcast %694 : vector<1x20xf32> to vector<16x20xf32>
    %696 = arith.select %693, %695, %689 : vector<16x20xi1>, vector<16x20xf32>
    %697 = vector.extract_strided_slice %696 {offsets = [15, 15], sizes = [1, 1], strides = [1, 1]} : vector<16x20xf32> to vector<1x1xf32>
    %cst_106 = arith.constant 1.000000e+00 : f32
    %698 = vector.broadcast %cst_106 : f32 to vector<1x1xf32>
    %699 = arith.divf %698, %697 : vector<1x1xf32>
    %700 = vector.extract_strided_slice %696 {offsets = [15, 0], sizes = [1, 20], strides = [1, 1]} : vector<16x20xf32> to vector<1x20xf32>
    %701 = vector.broadcast %699 : vector<1x1xf32> to vector<1x20xf32>
    %702 = arith.mulf %700, %701 : vector<1x20xf32>
    %703 = vector.extract_strided_slice %696 {offsets = [0, 15], sizes = [16, 1], strides = [1, 1]} : vector<16x20xf32> to vector<16x1xf32>
    %704 = vector.broadcast %703 : vector<16x1xf32> to vector<16x20xf32>
    %705 = vector.broadcast %702 : vector<1x20xf32> to vector<16x20xf32>
    %706 = arith.mulf %704, %705 : vector<16x20xf32>
    %707 = arith.subf %696, %706 : vector<16x20xf32>
    %c15_i32_107 = arith.constant 15 : i32
    %708 = vector.broadcast %c15_i32_107 : i32 to vector<16x1xi32>
    %709 = arith.cmpi eq, %107, %708 : vector<16x1xi32>
    %710 = vector.shape_cast %709 : vector<16x1xi1> to vector<16x1xi1>
    %711 = vector.broadcast %710 : vector<16x1xi1> to vector<16x20xi1>
    %712 = vector.shape_cast %702 : vector<1x20xf32> to vector<1x20xf32>
    %713 = vector.broadcast %712 : vector<1x20xf32> to vector<16x20xf32>
    %714 = arith.select %711, %713, %707 : vector<16x20xi1>, vector<16x20xf32>
    %715 = vector.extract_strided_slice %714 {offsets = [0, 16], sizes = [16, 4], strides = [1, 1]} : vector<16x20xf32> to vector<16x4xf32>
    %cst_108 = arith.constant dense<0.000000e+00> : vector<4x256xf32>
    %716 = tpu.matmul %715, %424, %cst_108 {dimension_numbers = #tpu.dot_dimension_numbers<[0], [0], [1], [1], [0, 1, 1, 1], [], []>} : vector<16x4xf32>, vector<16x256xf32>, vector<4x256xf32> -> vector<4x256xf32>
    %c1 = arith.constant 1 : index
    %c0_109 = arith.constant 0 : index
    %c0_110 = arith.constant 0 : index
    %717 = vector.load %arg13[%c1, %c0_109, %c0_110] : memref<2x4x256xf32, #tpu.memory_space<vmem>>, vector<1x4x256xf32>
    %718 = vector.shape_cast %717 : vector<1x4x256xf32> to vector<4x256xf32>
    %719 = vector.shape_cast %716 : vector<4x256xf32> to vector<1x4x256xf32>
    tpu.vector_store %arg13[%c1, %c0_109, %c0_110], %719 {strides = array<i32>} : memref<2x4x256xf32, #tpu.memory_space<vmem>>, vector<1x4x256xf32>,
    return
  }
}

</mosaic_0001>

<bundles_post_ra>
// kernel: subspace_forward.1
= control target key start
LH: loop header
LB: loop body
LE: loop exit
PB: predicated region body
PF: predicated region fallthrough
CT: control target
= control target key end

     0   :  { %vm71_vm0 = vcmask 1043456   ;;  %v2525_v2 = vmov 0.0   ;;  %v2526_v5 = vmov 0   ;;  %vm64_vm1 = vcmask 31744   ;;  %s3159_s0 = inlined_call_operand.vmem [shape: f32[2,4,256], index: 0, kind: input, shape index: {}]   ;;  %s3160_s1 = inlined_call_operand.vmem [shape: f32[16,4], index: 1, kind: input, shape index: {}]   ;;  %s3161_s2 = inlined_call_operand.vmem [shape: f32[16,1], index: 2, kind: input, shape index: {}]   ;;  %s3162_s6 = inlined_call_operand.vmem [shape: f32[16,1], index: 6, kind: input, shape index: {}]   ;;  %s3163_s3 = inlined_call_operand.vmem [shape: f32[16,1], index: 3, kind: input, shape index: {}]   ;;  %s3164_s4 = inlined_call_operand.vmem [shape: f32[16,1], index: 4, kind: input, shape index: {}]   ;;  %s3165_s5 = inlined_call_operand.vmem [shape: f32[16,16], index: 5, kind: input, shape index: {}]   ;;  %s3166_s7 = inlined_call_operand.vmem [shape: f32[16,1], index: 7, kind: input, shape index: {}]   ;;  %s3167_s8 = inlined_call_operand.vmem [shape: f32[16,1], index: 8, kind: input, shape index: {}]   ;;  %s3168_s10 = inlined_call_operand.vmem [shape: f32[16,1], index: 10, kind: input, shape index: {}]   ;;  %s3169_s9 = inlined_call_operand.vmem [shape: f32[16,16], index: 9, kind: input, shape index: {}]   ;;  %s3170_s11 = inlined_call_operand.vmem [shape: f32[16,1], index: 11, kind: input, shape index: {}]   ;;  %s3171_s12 = inlined_call_operand.vmem [shape: f32[16,1], index: 12, kind: input, shape index: {}]   ;;  %s3172_s13 = inlined_call_operand.vmem [shape: f32[2,4,256], index: 13, kind: output, shape index: {}]  }
   0x1   :  { %v2616_v0 = vld [vmem:[%s3159_s0] sm:$0xff]  ;;  %v45_v1 = vld [vmem:[%s3159_s0 + $0x8] sm:$0xff]  ;;  %144 = vmatprep.mubr.f32.mxu0 %v2525_v2  ;;  %221 = vmatprep.mubr.f32.mxu1 %v2525_v2  ;;  %vm360_vm9 = vcmask 130048  }
   0x2   :  { %v2625_v3 = vcombine.high %v2616_v0, %v2616_v0  ;;  %v2627_v4 = vcombine.high %v45_v1, %v45_v1  ;;  %2366 = vset.pattern.permute.xlu0 %v2526_v5  ;;  %v53_v6 = vld [vmem:[%s3161_s2 + $0x8] sm:$0xff]  ;;  %2367 = vset.pattern.permute.xlu1 %v2526_v5  ;;  %v50_v7 = vld [vmem:[%s3160_s1] sm:$0xff] }
   0x3   :  { %61 = vperm.xlu0 %2366, %v53_v6   ;;  %v52_v8 = vld [vmem:[%s3161_s2] sm:$0xff]  ;;  %v51_v9 = vld [vmem:[%s3160_s1 + $0x8] sm:$0xff] }
   0x4   :  { %2329 = vmatprep.subr.msk.mxu0 %vm71_vm0, %v2625_v3  ;;  %2333 = vmatprep.subr.msk.mxu1 %vm71_vm0, %v2627_v4  ;;  %v349_v48 = vld [vmem:[%s3162_s6 + $0x8] sm:$0xff] }
   0x5   :  { %2330 = vmatpush1.msk.msra.mxu0 %vm71_vm0, %v2616_v0  ;;  %2334 = vmatpush1.msk.msra.mxu1 %vm71_vm0, %v45_v1 }
   0x6   :  { %2331 = vmatmul.mubr.msk.f32.vlgmr.msra.gmra.mxu0 %vm64_vm1, %v50_v7  ;;  %2335 = vmatmul.mubr.msk.f32.vlgmr.msra.gmra.mxu1 %vm64_vm1, %v50_v7  ;;  %v234_v7 = vld [vmem:[%s3163_s3] sm:$0xff] }
   0x7   :  { %150 = vmatprep.mubr.f32.mxu0 %v2525_v2  ;;  %227 = vmatprep.mubr.f32.mxu1 %v2525_v2 }
   0x8   :  { %56 = vperm.xlu0 %2366, %v52_v8   ;;  %v235_v8 = vld [vmem:[%s3163_s3 + $0x8] sm:$0xff] }
   0xa   :  { %2332 = vmatmul.mubr.msk.f32.gmra.mxu0 %vm64_vm1, %v51_v9  ;;  %2336 = vmatmul.mubr.msk.f32.gmra.mxu1 %vm64_vm1, %v51_v9 }
   0xb   :  { %431 = vmatprep.mubr.f32.mxu0 %v2525_v2  ;;  %508 = vmatprep.mubr.f32.mxu1 %v2525_v2 }
  0x7e   :  { %v62_v10 = vpop.permute.xlu0 %61 }
  0x83   :  { %v57_v13 = vpop.permute.xlu0 %56 }
  0xc6   :  { %v146_v11 = vpop.f32.mrf.mxu0  ;;  %v223_v12 = vpop.f32.mrf.mxu1 }
  0xc7   :  { %v2654_v16 = vadd.f32 %v146_v11, %v57_v13  ;;  %v2662_v22 = vadd.f32 %v223_v12, %v57_v13 }
  0xc8   :  { %v148_v14 = vpop.f32.mrf.mxu0  ;;  %v225_v15 = vpop.f32.mrf.mxu1 }
  0xc9   :  { %v2656_v17 = vadd.f32 %v148_v14, %v57_v13  ;;  %v248_v28 = vmul.f32 %v2654_v16, %v2654_v16  ;;  %v2672_v29 = vadd.f32 %v225_v15, %v57_v13  ;;  %v250_v40 = vmul.f32 %v2662_v22, %v2662_v22  ;;  %v237_v13 = vld [vmem:[%s3164_s4 + $0x8] sm:$0xff] }
  0xca   :  { %v152_v18 = vpop.f32.mrf.mxu0  ;;  %v229_v19 = vpop.f32.mrf.mxu1 }
  0xcb   :  { %v2658_v20 = vadd.f32 %v152_v18, %v62_v10  ;;  %v238_v21 = vadd.f32 %v2656_v17, %v2654_v16  ;;  %v249_v23 = vmul.f32 %v2656_v17, %v2656_v17  ;;  %v2666_v26 = vadd.f32 %v229_v19, %v62_v10  ;;  %v236_v18 = vld [vmem:[%s3164_s4] sm:$0xff] }
  0xcc   :  { %v154_v24 = vpop.f32.mrf.mxu0  ;;  %v231_v25 = vpop.f32.mrf.mxu1  ;;  %v251_v46 = vmul.f32 %v2672_v29, %v2672_v29 }
  0xcd   :  { %v2668_v27 = vadd.f32 %v154_v24, %v62_v10  ;;  %v239_v30 = vadd.f32 %v238_v21, %v2662_v22  ;;  %v252_v31 = vmul.f32 %v2658_v20, %v2658_v20  ;;  %v2681_v34 = vadd.f32 %v231_v25, %v62_v10  ;;  %v348_v21 = vld [vmem:[%s3162_s6] sm:$0xff] }
  0xce   :  { %v256_v36 = vadd.f32 %v249_v23, %v248_v28  ;;  %v254_v37 = vmul.f32 %v2666_v26, %v2666_v26 }
  0xcf   :  { %v243_v32 = vadd.f32 %v2668_v27, %v2658_v20  ;;  %v253_v33 = vmul.f32 %v2668_v27, %v2668_v27  ;;  %v240_v35 = vadd.f32 %v239_v30, %v2672_v29  ;;  %v255_v42 = vmul.f32 %v2681_v34, %v2681_v34 }
  0xd0   :  { %v257_v44 = vadd.f32 %v256_v36, %v250_v40 }
  0xd1   :  { %v244_v38 = vadd.f32 %v243_v32, %v2666_v26  ;;  %v261_v39 = vadd.f32 %v253_v33, %v252_v31  ;;  %241 = vadd.xlane.f32.xlu1 %v240_v35 }
  0xd2   :  { %v258_v47 = vadd.f32 %v257_v44, %v251_v46 }
  0xd3   :  { %v245_v41 = vadd.f32 %v244_v38, %v2681_v34  ;;  %v262_v43 = vadd.f32 %v261_v39, %v254_v37 }
  0xd5   :  { %v263_v45 = vadd.f32 %v262_v43, %v255_v42  ;;  %246 = vadd.xlane.f32.xlu1 %v245_v41 }
  0xd7   :  { %264 = vadd.xlane.f32.xlu0 %v263_v45 }
  0xd9   :  { %259 = vadd.xlane.f32.xlu1 %v258_v47 }
  0xed   :  { %357 = vperm.xlu0 %2366, %v349_v48  }
 0x15a   :  { %v242_v49 = vpop.xlane.xlu1 %241 }
 0x15b   :  { %v266_v51 = vmul.f32 0.001953125, %v242_v49 }
 0x15d   :  { %v270_v57 = vmul.f32 %v266_v51, %v266_v51 }
 0x15e   :  { %v247_v50 = vpop.xlane.xlu1 %246 }
 0x15f   :  { %v267_v52 = vmul.f32 0.001953125, %v247_v50 }
 0x160   :  { %v265_v53 = vpop.xlane.xlu0 %264 }
 0x161   :  { %v269_v54 = vmul.f32 0.001953125, %v265_v53  ;;  %v271_v55 = vmul.f32 %v267_v52, %v267_v52 }
 0x162   :  { %v260_v56 = vpop.xlane.xlu1 %259 }
 0x163   :  { %v273_v58 = vsub.f32 %v269_v54, %v271_v55  ;;  %v268_v59 = vmul.f32 0.001953125, %v260_v56  ;;  %v347_v56 = vld [vmem:[%s3165_s5 + $0x8] sm:$0xff] }
 0x165   :  { %v275_v60 = vmax.f32 %v273_v58, 0.0  ;;  %v272_v61 = vsub.f32 %v268_v59, %v270_v57 }
 0x167   :  { %v277_v62 = vadd.f32 1e-05, %v275_v60  ;;  %v274_v63 = vmax.f32 %v272_v61, 0.0 }
 0x169   :  { %2440 = vrsqrt.f32 %v277_v62  ;;  %v276_v1 = vadd.f32 1e-05, %v274_v63 }
 0x16b   :  { %2442 = vrsqrt.f32 %v276_v1 }
 0x176   :  { %v2441_v6 = vpop.eup %2440 }
 0x177   :  { %v281_v11 = vmul.f32 %v2441_v6, %v235_v8  ;;  %v358_v6 = vpop.permute.xlu0 %357 }
 0x178   :  { %v2443_v9 = vpop.eup %2442 }
 0x179   :  { %v280_v10 = vmul.f32 %v2443_v9, %v234_v7  ;;  %v283_v12 = vmul.f32 %v281_v11, %v267_v52  ;;  %v346_v52 = vld [vmem:[%s3165_s5] sm:$0xff] }
 0x17b   :  { %288 = vperm.xlu1 %2367, %v280_v10   ;;  %v285_v14 = vsub.f32 %v237_v13, %v283_v12  ;;  %v282_v15 = vmul.f32 %v280_v10, %v266_v51 }
 0x17d   :  { %v284_v19 = vsub.f32 %v236_v18, %v282_v15 }
 0x17f   :  { %293 = vperm.xlu1 %2367, %v281_v11  }
 0x183   :  { %311 = vperm.xlu1 %2367, %v285_v14  }
 0x187   :  { %306 = vperm.xlu1 %2367, %v284_v19  }
 0x18b   :  { %352 = vperm.xlu1 %2367, %v348_v21  }
 0x1f6   :  { %v289_v23 = vpop.permute.xlu1 %288 }
 0x1f7   :  { %v296_v38 = vmul.f32 %v289_v23, %v2654_v16  ;;  %v298_v39 = vmul.f32 %v289_v23, %v2662_v22  ;;  %v297_v40 = vmul.f32 %v289_v23, %v2656_v17  ;;  %v299_v41 = vmul.f32 %v289_v23, %v2672_v29 }
 0x1fa   :  { %v294_v24 = vpop.permute.xlu1 %293 }
 0x1fb   :  { %v300_v25 = vmul.f32 %v294_v24, %v2658_v20  ;;  %v302_v28 = vmul.f32 %v294_v24, %v2666_v26  ;;  %v301_v30 = vmul.f32 %v294_v24, %v2668_v27  ;;  %v303_v31 = vmul.f32 %v294_v24, %v2681_v34 }
 0x1fe   :  { %v312_v32 = vpop.permute.xlu1 %311 }
 0x1ff   :  { %v319_v33 = vadd.f32 %v312_v32, %v301_v30  ;;  %v321_v35 = vadd.f32 %v312_v32, %v303_v31  ;;  %v318_v36 = vadd.f32 %v312_v32, %v300_v25  ;;  %v320_v37 = vadd.f32 %v312_v32, %v302_v28 }
 0x201   :  { %vm327_vm2 = vcmp.ge.f32.partialorder %v319_v33, 0.0  ;;  %v335_v20 = vmul.f32 0.01, %v319_v33  ;;  %vm329_vm3 = vcmp.ge.f32.partialorder %v321_v35, 0.0  ;;  %v337_v26 = vmul.f32 0.01, %v321_v35 }
 0x202   :  { %v307_v27 = vpop.permute.xlu1 %306  ;;  %vm326_vm4 = vcmp.ge.f32.partialorder %v318_v36, 0.0  ;;  %v334_v34 = vmul.f32 0.01, %v318_v36  ;;  %vm328_vm5 = vcmp.ge.f32.partialorder %v320_v37, 0.0  ;;  %v336_v42 = vmul.f32 0.01, %v320_v37 }
 0x203   :  { %v2720_v43 = vsel %vm327_vm2, %v319_v33, %v335_v20  ;;  %v2722_v44 = vsel %vm329_vm3, %v321_v35, %v337_v26  ;;  %v315_v16 = vadd.f32 %v307_v27, %v297_v40  ;;  %v317_v45 = vadd.f32 %v307_v27, %v299_v41 }
 0x204   :  { %395 = vmatprep.subr.mxu0 %v2720_v43  ;;  %472 = vmatprep.subr.mxu1 %v2722_v44  ;;  %v2726_v17 = vsel %vm326_vm4, %v318_v36, %v334_v34  ;;  %v2728_v22 = vsel %vm328_vm5, %v320_v37, %v336_v42  ;;  %v314_v29 = vadd.f32 %v307_v27, %v296_v38 }
 0x205   :  { %396 = vmatpush1.msra.mxu0 %v2726_v17  ;;  %473 = vmatpush1.msra.mxu1 %v2728_v22  ;;  %vm323_vm6 = vcmp.ge.f32.partialorder %v315_v16, 0.0  ;;  %v331_v46 = vmul.f32 0.01, %v315_v16  ;;  %vm325_vm7 = vcmp.ge.f32.partialorder %v317_v45, 0.0  ;;  %v333_v47 = vmul.f32 0.01, %v317_v45 }
 0x206   :  { %vm322_vm8 = vcmp.ge.f32.partialorder %v314_v29, 0.0  ;;  %v330_v48 = vmul.f32 0.01, %v314_v29  ;;  %v316_v49 = vadd.f32 %v307_v27, %v298_v39  ;;  %v353_v58 = vpop.permute.xlu1 %352 }
 0x207   :  { %v2732_v50 = vsel %vm323_vm6, %v315_v16, %v331_v46  ;;  %v2734_v51 = vsel %vm325_vm7, %v317_v45, %v333_v47 }
 0x208   :  { %397 = vmatprep.subr.mxu0 %v2732_v50  ;;  %474 = vmatprep.subr.mxu1 %v2734_v51  ;;  %v2741_v53 = vsel %vm322_vm8, %v314_v29, %v330_v48  ;;  %vm324_vm10 = vcmp.ge.f32.partialorder %v316_v49, 0.0  ;;  %v332_v54 = vmul.f32 0.01, %v316_v49 }
 0x209   :  { %398 = vmatpush1.msra.mxu0 %v2741_v53 }
 0x20a   :  { %v2744_v55 = vsel %vm324_vm10, %v316_v49, %v332_v54  ;;  %2337 = vmatmul.mubr.msk.f32.vlgmr.msra.gmra.mxu0 %vm360_vm9, %v346_v52 }
 0x20b   :  { %475 = vmatpush1.msra.mxu1 %v2744_v55  ;;  %437 = vmatprep.mubr.f32.mxu0 %v2525_v2 }
 0x20c   :  { %2339 = vmatmul.mubr.msk.f32.vlgmr.msra.gmra.mxu1 %vm360_vm9, %v346_v52 }
 0x20d   :  { %514 = vmatprep.mubr.f32.mxu1 %v2525_v2 }
 0x20e   :  { %2338 = vmatmul.mubr.msk.f32.gmra.mxu0 %vm360_vm9, %v347_v56 }
 0x20f   :  { %717 = vmatprep.mubr.f32.mxu0 %v2525_v2 }
 0x210   :  { %2340 = vmatmul.mubr.msk.f32.gmra.mxu1 %vm360_vm9, %v347_v56 }
 0x211   :  { %794 = vmatprep.mubr.f32.mxu1 %v2525_v2 }
 0x2ca   :  { %v433_v57 = vpop.f32.mrf.mxu0 }
 0x2cb   :  { %v2758_v61 = vadd.f32 %v433_v57, %v353_v58 }
 0x2cc   :  { %v510_v59 = vpop.f32.mrf.mxu1  ;;  %v435_v60 = vpop.f32.mrf.mxu0 }
 0x2cd   :  { %v2760_v62 = vadd.f32 %v435_v60, %v353_v58  ;;  %v2762_v7 = vadd.f32 %v510_v59, %v353_v58  ;;  %v535_v25 = vmul.f32 %v2758_v61, %v2758_v61  ;;  %v522_v60 = vld [vmem:[%s3166_s7 + $0x8] sm:$0xff] }
 0x2ce   :  { %v512_v63 = vpop.f32.mrf.mxu1  ;;  %v439_v1 = vpop.f32.mrf.mxu0 }
 0x2cf   :  { %v525_v8 = vadd.f32 %v2760_v62, %v2758_v61  ;;  %v2766_v9 = vadd.f32 %v439_v1, %v358_v6  ;;  %v2773_v15 = vadd.f32 %v512_v63, %v353_v58  ;;  %v536_v19 = vmul.f32 %v2760_v62, %v2760_v62 }
 0x2d0   :  { %v516_v10 = vpop.f32.mrf.mxu1  ;;  %v441_v11 = vpop.f32.mrf.mxu0  ;;  %v537_v38 = vmul.f32 %v2762_v7, %v2762_v7 }
 0x2d1   :  { %v2768_v12 = vadd.f32 %v516_v10, %v358_v6  ;;  %v2770_v13 = vadd.f32 %v441_v11, %v358_v6  ;;  %v526_v14 = vadd.f32 %v525_v8, %v2762_v7  ;;  %v539_v21 = vmul.f32 %v2766_v9, %v2766_v9  ;;  %v521_v8 = vld [vmem:[%s3166_s7] sm:$0xff] }
 0x2d2   :  { %v518_v18 = vpop.f32.mrf.mxu1  ;;  %v543_v37 = vadd.f32 %v536_v19, %v535_v25  ;;  %v538_v20 = vmul.f32 %v2773_v15, %v2773_v15  ;;  %v523_v19 = vld [vmem:[%s3167_s8] sm:$0xff] }
 0x2d3   :  { %v530_v23 = vadd.f32 %v2770_v13, %v2766_v9  ;;  %v540_v24 = vmul.f32 %v2770_v13, %v2770_v13  ;;  %v527_v28 = vadd.f32 %v526_v14, %v2773_v15  ;;  %v541_v30 = vmul.f32 %v2768_v12, %v2768_v12  ;;  %v635_v25 = vld [vmem:[%s3168_s10] sm:$0xff] }
 0x2d4   :  { %v2788_v31 = vadd.f32 %v518_v18, %v358_v6  ;;  %v544_v41 = vadd.f32 %v543_v37, %v537_v38  ;;  %v524_v6 = vld [vmem:[%s3167_s8 + $0x8] sm:$0xff] }
 0x2d5   :  { %v531_v32 = vadd.f32 %v530_v23, %v2768_v12  ;;  %v548_v33 = vadd.f32 %v540_v24, %v539_v21  ;;  %528 = vadd.xlane.f32.xlu0 %v527_v28  ;;  %v636_v23 = vld [vmem:[%s3168_s10 + $0x8] sm:$0xff] }
 0x2d6   :  { %v542_v39 = vmul.f32 %v2788_v31, %v2788_v31  ;;  %v545_v26 = vadd.f32 %v544_v41, %v538_v20 }
 0x2d7   :  { %v532_v35 = vadd.f32 %v531_v32, %v2788_v31  ;;  %v549_v36 = vadd.f32 %v548_v33, %v541_v30 }
 0x2d9   :  { %533 = vadd.xlane.f32.xlu1 %v532_v35  ;;  %v550_v40 = vadd.f32 %v549_v36, %v542_v39 }
 0x2dd   :  { %551 = vadd.xlane.f32.xlu1 %v550_v40 }
 0x2e1   :  { %546 = vadd.xlane.f32.xlu1 %v545_v26 }
 0x35e   :  { %v529_v42 = vpop.xlane.xlu0 %528 }
 0x35f   :  { %v553_v45 = vmul.f32 0.001953125, %v529_v42 }
 0x361   :  { %v557_v49 = vmul.f32 %v553_v45, %v553_v45 }
 0x362   :  { %v534_v27 = vpop.xlane.xlu1 %533 }
 0x363   :  { %v554_v34 = vmul.f32 0.001953125, %v534_v27 }
 0x365   :  { %v558_v29 = vmul.f32 %v554_v34, %v554_v34 }
 0x366   :  { %v552_v16 = vpop.xlane.xlu1 %551 }
 0x367   :  { %v556_v46 = vmul.f32 0.001953125, %v552_v16 }
 0x369   :  { %v560_v47 = vsub.f32 %v556_v46, %v558_v29 }
 0x36a   :  { %v547_v48 = vpop.xlane.xlu1 %546 }
 0x36b   :  { %v562_v52 = vmax.f32 %v560_v47, 0.0  ;;  %v555_v54 = vmul.f32 0.001953125, %v547_v48 }
 0x36d   :  { %v564_v56 = vadd.f32 1e-05, %v562_v52  ;;  %v559_v57 = vsub.f32 %v555_v54, %v557_v49 }
 0x36f   :  { %2444 = vrsqrt.f32 %v564_v56  ;;  %v561_v58 = vmax.f32 %v559_v57, 0.0  ;;  %v633_v56 = vld [vmem:[%s3169_s9] sm:$0xff] }
 0x371   :  { %v563_v59 = vadd.f32 1e-05, %v561_v58 }
 0x373   :  { %2446 = vrsqrt.f32 %v563_v59 }
 0x37c   :  { %v2445_v63 = vpop.eup %2444 }
 0x37d   :  { %v568_v1 = vmul.f32 %v2445_v63, %v522_v60  ;;  %v634_v60 = vld [vmem:[%s3169_s9 + $0x8] sm:$0xff] }
 0x37f   :  { %580 = vperm.xlu1 %2367, %v568_v1   ;;  %v570_v10 = vmul.f32 %v568_v1, %v554_v34 }
 0x380   :  { %v2447_v11 = vpop.eup %2446 }
 0x381   :  { %v572_v14 = vsub.f32 %v524_v6, %v570_v10  ;;  %v567_v18 = vmul.f32 %v2447_v11, %v521_v8 }
 0x383   :  { %598 = vperm.xlu1 %2367, %v572_v14   ;;  %575 = vperm.xlu0 %2366, %v567_v18   ;;  %v569_v21 = vmul.f32 %v567_v18, %v553_v45 }
 0x385   :  { %v571_v24 = vsub.f32 %v523_v19, %v569_v21 }
 0x387   :  { %644 = vperm.xlu0 %2366, %v636_v23   ;;  %593 = vperm.xlu1 %2367, %v571_v24  }
 0x38b   :  { %639 = vperm.xlu1 %2367, %v635_v25  }
 0x3fa   :  { %v581_v28 = vpop.permute.xlu1 %580 }
 0x3fb   :  { %v587_v30 = vmul.f32 %v581_v28, %v2766_v9  ;;  %v589_v32 = vmul.f32 %v581_v28, %v2768_v12  ;;  %v588_v36 = vmul.f32 %v581_v28, %v2770_v13  ;;  %v590_v37 = vmul.f32 %v581_v28, %v2788_v31 }
 0x3fe   :  { %v576_v33 = vpop.permute.xlu0 %575  ;;  %v599_v35 = vpop.permute.xlu1 %598 }
 0x3ff   :  { %v606_v38 = vadd.f32 %v599_v35, %v588_v36  ;;  %v608_v39 = vadd.f32 %v599_v35, %v590_v37  ;;  %v605_v40 = vadd.f32 %v599_v35, %v587_v30  ;;  %v607_v41 = vadd.f32 %v599_v35, %v589_v32 }
 0x400   :  { %v583_v20 = vmul.f32 %v576_v33, %v2758_v61  ;;  %v584_v26 = vmul.f32 %v576_v33, %v2760_v62  ;;  %v585_v27 = vmul.f32 %v576_v33, %v2762_v7  ;;  %v586_v9 = vmul.f32 %v576_v33, %v2773_v15 }
 0x401   :  { %vm614_vm11 = vcmp.ge.f32.partialorder %v606_v38, 0.0  ;;  %v622_v12 = vmul.f32 0.01, %v606_v38  ;;  %vm616_vm12 = vcmp.ge.f32.partialorder %v608_v39, 0.0  ;;  %v624_v42 = vmul.f32 0.01, %v608_v39 }
 0x402   :  { %v594_v34 = vpop.permute.xlu1 %593  ;;  %vm613_vm13 = vcmp.ge.f32.partialorder %v605_v40, 0.0  ;;  %v621_v13 = vmul.f32 0.01, %v605_v40  ;;  %vm615_vm14 = vcmp.ge.f32.partialorder %v607_v41, 0.0  ;;  %v623_v31 = vmul.f32 0.01, %v607_v41  ;;  %v645_v14 = vpop.permute.xlu0 %644 }
 0x403   :  { %v630_v16 = vsel %vm614_vm11, %v606_v38, %v622_v12  ;;  %v632_v45 = vsel %vm616_vm12, %v608_v39, %v624_v42  ;;  %v602_v29 = vadd.f32 %v594_v34, %v584_v26  ;;  %v604_v46 = vadd.f32 %v594_v34, %v586_v9 }
 0x404   :  { %681 = vmatprep.subr.mxu0 %v630_v16  ;;  %758 = vmatprep.subr.mxu1 %v632_v45  ;;  %v629_v61 = vsel %vm613_vm13, %v605_v40, %v621_v13  ;;  %v631_v62 = vsel %vm615_vm14, %v607_v41, %v623_v31  ;;  %v601_v7 = vadd.f32 %v594_v34, %v583_v20 }
 0x405   :  { %682 = vmatpush1.msra.mxu0 %v629_v61  ;;  %759 = vmatpush1.msra.mxu1 %v631_v62  ;;  %vm610_vm15 = vcmp.ge.f32.partialorder %v602_v29, 0.0  ;;  %v618_v15 = vmul.f32 0.01, %v602_v29  ;;  %vm612_vm0 = vcmp.ge.f32.partialorder %v604_v46, 0.0  ;;  %v620_v47 = vmul.f32 0.01, %v604_v46 }
 0x406   :  { %vm609_vm1 = vcmp.ge.f32.partialorder %v601_v7, 0.0  ;;  %v617_v48 = vmul.f32 0.01, %v601_v7  ;;  %v603_v49 = vadd.f32 %v594_v34, %v585_v27  ;;  %v640_v6 = vpop.permute.xlu1 %639 }
 0x407   :  { %v626_v52 = vsel %vm610_vm15, %v602_v29, %v618_v15  ;;  %v628_v54 = vsel %vm612_vm0, %v604_v46, %v620_v47 }
 0x408   :  { %683 = vmatprep.subr.mxu0 %v626_v52  ;;  %760 = vmatprep.subr.mxu1 %v628_v54  ;;  %v625_v57 = vsel %vm609_vm1, %v601_v7, %v617_v48  ;;  %vm611_vm2 = vcmp.ge.f32.partialorder %v603_v49, 0.0  ;;  %v619_v58 = vmul.f32 0.01, %v603_v49 }
 0x409   :  { %684 = vmatpush1.msra.mxu0 %v625_v57 }
 0x40a   :  { %v627_v59 = vsel %vm611_vm2, %v603_v49, %v619_v58  ;;  %2341 = vmatmul.mubr.msk.f32.vlgmr.msra.gmra.mxu0 %vm360_vm9, %v633_v56  ;;  %951 = vmatprep.subr.mxu0 %v2625_v3 }
 0x40b   :  { %761 = vmatpush1.msra.mxu1 %v627_v59  ;;  %723 = vmatprep.mubr.f32.mxu0 %v2525_v2 }
 0x40c   :  { %2343 = vmatmul.mubr.msk.f32.vlgmr.msra.gmra.mxu1 %vm360_vm9, %v633_v56  ;;  %952 = vmatpush1.xpose.msra.mxu0 %v2616_v0 }
 0x40d   :  { %800 = vmatprep.mubr.f32.mxu1 %v2525_v2 }
 0x40e   :  { %2342 = vmatmul.mubr.msk.f32.gmra.mxu0 %vm360_vm9, %v634_v60 }
 0x410   :  { %2344 = vmatmul.mubr.msk.f32.gmra.mxu1 %vm360_vm9, %v634_v60 }
 0x411   :  { %1651 = vmatprep.mubr.f32.mxu1 %v2525_v2 }
 0x4ca   :  { %v719_v3 = vpop.f32.mrf.mxu0 }
 0x4cb   :  { %v2841_v18 = vadd.f32 %v719_v3, %v640_v6 }
 0x4cc   :  { %v796_v63 = vpop.f32.mrf.mxu1  ;;  %v721_v1 = vpop.f32.mrf.mxu0 }
 0x4cd   :  { %v2839_v8 = vadd.f32 %v721_v1, %v640_v6  ;;  %v2861_v37 = vadd.f32 %v796_v63, %v640_v6  ;;  %v821_v38 = vmul.f32 %v2841_v18, %v2841_v18  ;;  %v808_v63 = vld [vmem:[%s3170_s11 + $0x8] sm:$0xff] }
 0x4ce   :  { %v798_v10 = vpop.f32.mrf.mxu1  ;;  %v725_v11 = vpop.f32.mrf.mxu0 }
 0x4cf   :  { %v2843_v0 = vadd.f32 %v725_v11, %v645_v14  ;;  %v811_v25 = vadd.f32 %v2839_v8, %v2841_v18  ;;  %v822_v28 = vmul.f32 %v2839_v8, %v2839_v8  ;;  %v823_v12 = vmul.f32 %v2861_v37, %v2861_v37 }
 0x4d0   :  { %v802_v19 = vpop.f32.mrf.mxu1  ;;  %v727_v21 = vpop.f32.mrf.mxu0  ;;  %v2874_v42 = vadd.f32 %v798_v10, %v640_v6  ;;  %v810_v10 = vld [vmem:[%s3171_s12 + $0x8] sm:$0xff] }
 0x4d1   :  { %v2845_v23 = vadd.f32 %v802_v19, %v645_v14  ;;  %v2847_v24 = vadd.f32 %v727_v21, %v645_v14  ;;  %v825_v32 = vmul.f32 %v2843_v0, %v2843_v0  ;;  %v812_v20 = vadd.f32 %v811_v25, %v2861_v37 }
 0x4d2   :  { %v804_v30 = vpop.f32.mrf.mxu1  ;;  %v829_v34 = vadd.f32 %v822_v28, %v821_v38  ;;  %v824_v45 = vmul.f32 %v2874_v42, %v2874_v42  ;;  %v809_v28 = vld [vmem:[%s3171_s12] sm:$0xff] }
 0x4d3   :  { %v816_v33 = vadd.f32 %v2847_v24, %v2843_v0  ;;  %v826_v35 = vmul.f32 %v2847_v24, %v2847_v24  ;;  %v2859_v36 = vadd.f32 %v804_v30, %v645_v14  ;;  %v827_v39 = vmul.f32 %v2845_v23, %v2845_v23  ;;  %v807_v14 = vld [vmem:[%s3170_s11] sm:$0xff]  ;;  %s2542_s11 = smov 112  }
 0x4d4   :  { %v813_v31 = vadd.f32 %v812_v20, %v2874_v42  ;;  %v830_v16 = vadd.f32 %v829_v34, %v823_v12 }
 0x4d5   :  { %v817_v40 = vadd.f32 %v816_v33, %v2845_v23  ;;  %v834_v41 = vadd.f32 %v826_v35, %v825_v32  ;;  %v828_v27 = vmul.f32 %v2859_v36, %v2859_v36 }
 0x4d6   :  { %v831_v29 = vadd.f32 %v830_v16, %v824_v45 }
 0x4d7   :  { %v818_v26 = vadd.f32 %v817_v40, %v2859_v36  ;;  %v835_v9 = vadd.f32 %v834_v41, %v827_v39 }
 0x4d9   :  { %819 = vadd.xlane.f32.xlu0 %v818_v26  ;;  %v836_v13 = vadd.f32 %v835_v9, %v828_v27 }
 0x4db   :  { %837 = vadd.xlane.f32.xlu1 %v836_v13 }
 0x4dd   :  { %814 = vadd.xlane.f32.xlu0 %v813_v31 }
 0x4e1   :  { %832 = vadd.xlane.f32.xlu0 %v831_v29 }
 0x562   :  { %v820_v46 = vpop.xlane.xlu0 %819 }
 0x563   :  { %v840_v61 = vmul.f32 0.001953125, %v820_v46 }
 0x564   :  { %v838_v62 = vpop.xlane.xlu1 %837 }
 0x565   :  { %v844_v7 = vmul.f32 %v840_v61, %v840_v61  ;;  %v842_v15 = vmul.f32 0.001953125, %v838_v62 }
 0x566   :  { %v815_v47 = vpop.xlane.xlu0 %814 }
 0x567   :  { %v846_v48 = vsub.f32 %v842_v15, %v844_v7  ;;  %v839_v49 = vmul.f32 0.001953125, %v815_v47 }
 0x569   :  { %v848_v52 = vmax.f32 %v846_v48, 0.0  ;;  %v843_v57 = vmul.f32 %v839_v49, %v839_v49 }
 0x56a   :  { %v833_v54 = vpop.xlane.xlu0 %832 }
 0x56b   :  { %v850_v56 = vadd.f32 1e-05, %v848_v52  ;;  %v841_v58 = vmul.f32 0.001953125, %v833_v54 }
 0x56d   :  { %2448 = vrsqrt.f32 %v850_v56  ;;  %v845_v59 = vsub.f32 %v841_v58, %v843_v57  ;;  %v2527_v58 = vmov 1  }
 0x56f   :  { %v847_v60 = vmax.f32 %v845_v59, 0.0  ;;  %v903_v59 = vlaneseq }
 0x571   :  { %v849_v3 = vadd.f32 1e-05, %v847_v60 }
 0x573   :  { %2450 = vrsqrt.f32 %v849_v3 }
 0x57a   :  { %v2449_v1 = vpop.eup %2448 }
 0x57b   :  { %v854_v6 = vmul.f32 %v2449_v1, %v808_v63 }
 0x57d   :  { %866 = vperm.xlu1 %2367, %v854_v6   ;;  %v856_v11 = vmul.f32 %v854_v6, %v840_v61 }
 0x57f   :  { %v858_v19 = vsub.f32 %v810_v10, %v856_v11 }
 0x580   :  { %v2451_v21 = vpop.eup %2450 }
 0x581   :  { %884 = vperm.xlu0 %2366, %v858_v19   ;;  %v853_v25 = vmul.f32 %v2451_v21, %v807_v14  ;;  %v2528_v19 = vmov 2  }
 0x583   :  { %861 = vperm.xlu1 %2367, %v853_v25   ;;  %v855_v30 = vmul.f32 %v853_v25, %v839_v49 }
 0x585   :  { %v857_v32 = vsub.f32 %v809_v28, %v855_v30 }
 0x587   :  { %879 = vperm.xlu1 %2367, %v857_v32  }
 0x5f8   :  { %v2891_v33 = vpop.permute.xlu1 %866 }
 0x5f9   :  { %v873_v35 = vmul.f32 %v2891_v33, %v2843_v0  ;;  %v874_v38 = vmul.f32 %v2891_v33, %v2847_v24 }
 0x5fc   :  { %v2897_v39 = vpop.permute.xlu0 %884 }
 0x5fd   :  { %v891_v40 = vadd.f32 %v2897_v39, %v873_v35  ;;  %v892_v41 = vadd.f32 %v2897_v39, %v874_v38 }
 0x5fe   :  { %v2901_v20 = vpop.permute.xlu1 %861 }
 0x5ff   :  { %v899_v26 = vadd.f32 %v891_v40, %v2726_v17  ;;  %v900_v27 = vadd.f32 %v892_v41, %v2720_v43  ;;  %v869_v9 = vmul.f32 %v2901_v20, %v2841_v18  ;;  %v870_v0 = vmul.f32 %v2901_v20, %v2839_v8 }
 0x601   :  { %v908_v24 = vand.u32 2147483647, %v899_v26  ;;  %v909_v12 = vand.u32 2147483647, %v900_v27 }
 0x602   :  { %v2909_v34 = vpop.permute.xlu1 %879 }
 0x603   :  { %v887_v13 = vadd.f32 %v2909_v34, %v869_v9  ;;  %v888_v31 = vadd.f32 %v2909_v34, %v870_v0  ;;  %v913_v16 = vadd.f32 %v909_v12, %v908_v24  ;;  %v2529_v0 = vmov 3  }
 0x605   :  { %v895_v45 = vadd.f32 %v887_v13, %v2741_v53  ;;  %v896_v17 = vadd.f32 %v888_v31, %v2732_v50  ;;  %914 = vadd.xlane.f32.xlu0 %v913_v16 }
 0x607   :  { %v906_v43 = vand.u32 2147483647, %v895_v45  ;;  %v907_v29 = vand.u32 2147483647, %v896_v17 }
 0x609   :  { %v910_v18 = vadd.f32 %v907_v29, %v906_v43 }
 0x60b   :  { %911 = vadd.xlane.f32.xlu1 %v910_v18 }
 0x68e   :  { %v915_v46 = vpop.xlane.xlu0 %914 }
 0x68f   :  { %v917_v8 = vadd.f32 1e-06, %v915_v46 }
 0x691   :  { %2452 = vrcp.f32 %v917_v8 }
 0x694   :  { %v912_v61 = vpop.xlane.xlu1 %911 }
 0x695   :  { %v916_v62 = vadd.f32 1e-06, %v912_v61  ;;  %v2530_v61 = vmov 4  }
 0x697   :  { %2454 = vrcp.f32 %v916_v62 }
 0x69e   :  { %v2453_v7 = vpop.eup %2452 }
 0x69f   :  { %v923_v15 = vmul.f32 %v2453_v7, %v900_v27  ;;  %v922_v47 = vmul.f32 %v2453_v7, %v899_v26 }
 0x6a1   :  { %953 = vmatprep.subr.mxu0 %v923_v15  ;;  %1615 = vmatprep.subr.mxu1 %v923_v15 }
 0x6a2   :  { %954 = vmatpush1.xpose.msra.mxu0 %v922_v47  ;;  %1616 = vmatpush1.msra.mxu1 %v922_v47 }
 0x6a4   :  { %v2455_v53 = vpop.eup %2454 }
 0x6a5   :  { %v921_v50 = vmul.f32 %v2455_v53, %v896_v17  ;;  %v920_v48 = vmul.f32 %v2455_v53, %v895_v45 }
 0x6a7   :  { %955 = vmatprep.subr.mxu0 %v921_v50  ;;  %989 = vmatprep.mubr.f32.mxu0 %v921_v50 }
 0x6a8   :  { %1617 = vmatprep.subr.mxu1 %v921_v50  ;;  %956 = vmatpush1.xpose.msra.mxu0 %v920_v48 }
 0x6a9   :  { %1618 = vmatpush1.msra.mxu1 %v920_v48 }
 0x6aa   :  { %1708 = vmatprep.subr.mxu1 %v2627_v4  ;;  %v2919_v4 = vshrl.u32 %v903_v59, 7  ;;  %v2531_v59 = vmov 5  }
 0x6ab   :  { %990 = vmatmul.mubr.f32.vlgmr.msra.gmra.mxu0 %v920_v48 }
 0x6ac   :  { %994 = vmatprep.mubr.f32.mxu0 %v923_v15  ;;  %v2922_v60 = vsub.s32 0, %v2919_v4  ;;  %vm1026_vm3 = vcmp.eq.s32.totalorder %v2919_v4, 0  ;;  %v2932_v21 = vsub.s32 1, %v2919_v4  ;;  %vm1060_vm4 = vcmp.eq.s32.totalorder %v2919_v4, 1 }
 0x6ad   :  { %v2942_v24 = vsub.s32 2, %v2919_v4  ;;  %vm1094_vm5 = vcmp.eq.s32.totalorder %v2919_v4, 2  ;;  %v2951_v53 = vsub.s32 3, %v2919_v4  ;;  %vm1128_vm6 = vcmp.eq.s32.totalorder %v2919_v4, 3 }
 0x6ae   :  { %vm1162_vm7 = vcmp.eq.s32.totalorder %v2919_v4, 4  ;;  %vm1196_vm8 = vcmp.eq.s32.totalorder %v2919_v4, 5  ;;  %vm1230_vm10 = vcmp.eq.s32.totalorder %v2919_v4, 6  ;;  %vm1264_vm12 = vcmp.eq.s32.totalorder %v2919_v4, 7 }
 0x6af   :  { %995 = vmatmul.mubr.f32.gmra.mxu0 %v922_v47 }
 0x6b0   :  { %2312 = vmatprep.mubr.f32.mxu0 %v2525_v2 }
 0x76b   :  { %v991_v49 = vpop.f32.mrf.mxu0 }
 0x76c   :  { %2456 = vrcp.f32 %v991_v49  ;;  %1010 = vperm.xlu1 %2367, %v991_v49  }
 0x76d   :  { %v993_v52 = vpop.f32.mrf.mxu0 }
 0x76f   :  { %v996_v54 = vpop.f32.mrf.mxu0 }
 0x770   :  { %2369 = vset.pattern.permute.xlu1 %v2527_v58 }
 0x771   :  { %v998_v56 = vpop.f32.mrf.mxu0 }
 0x779   :  { %v2457_v57 = vpop.eup %2456 }
 0x77a   :  { %1004 = vperm.xlu0 %2366, %v2457_v57  }
 0x77e   :  { %2368 = vset.pattern.permute.xlu0 %v2527_v58 }
 0x7e7   :  { %v1011_v1 = vpop.permute.xlu1 %1010 }
 0x7f5   :  { %v1005_v2 = vpop.permute.xlu0 %1004 }
 0x7f6   :  { %v1007_v3 = vmul.f32 %v1005_v2, %v991_v49 }
 0x7f8   :  { %v1021_v63 = vrot.slane %v1007_v3, %v2922_v60 }
 0x7fa   :  { %v1022_v6 = vmul.f32 %v1021_v63, %v1011_v1  ;;  %v2961_v1 = vsub.s32 4, %v2919_v4 }
 0x7fc   :  { %v1024_v10 = vsub.f32 %v991_v49, %v1022_v6 }
 0x7fe   :  { %v1032_v11 = vsel %vm1026_vm3, %v1021_v63, %v1024_v10 }
 0x7ff   :  { %1044 = vperm.xlu1 %2369, %v1032_v11   ;;  %2458 = vrcp.f32 %v1032_v11 }
 0x803   :  { %2370 = vset.pattern.permute.xlu1 %v2526_v5 }
 0x804   :  { %1015 = vperm.xlu1 %2370, %v996_v54  }
 0x808   :  { %2372 = vset.pattern.permute.xlu1 %v2528_v19 }
 0x80c   :  { %v2459_v14 = vpop.eup %2458 }
 0x80d   :  { %1038 = vperm.xlu0 %2368, %v2459_v14  }
 0x811   :  { %2371 = vset.pattern.permute.xlu0 %v2528_v19 }
 0x87a   :  { %v1045_v25 = vpop.permute.xlu1 %1044 }
 0x87f   :  { %v1016_v38 = vpop.permute.xlu1 %1015 }
 0x880   :  { %v1023_v41 = vmul.f32 %v1021_v63, %v1016_v38 }
 0x882   :  { %v1025_v27 = vsub.f32 %v996_v54, %v1023_v41 }
 0x888   :  { %v1039_v28 = vpop.permute.xlu0 %1038 }
 0x889   :  { %v1041_v30 = vmul.f32 %v1039_v28, %v1032_v11 }
 0x88b   :  { %v1055_v32 = vrot.slane %v1041_v30, %v2932_v21 }
 0x88d   :  { %v1056_v35 = vmul.f32 %v1055_v32, %v1045_v25 }
 0x88f   :  { %v1058_v40 = vsub.f32 %v1032_v11, %v1056_v35  ;;  %v2532_v35 = vmov 6  }
 0x891   :  { %v1066_v26 = vsel %vm1060_vm4, %v1055_v32, %v1058_v40 }
 0x892   :  { %2460 = vrcp.f32 %v1066_v26  ;;  %1078 = vperm.xlu1 %2372, %v1066_v26  }
 0x896   :  { %2373 = vset.pattern.permute.xlu1 %v2527_v58 }
 0x897   :  { %1049 = vperm.xlu1 %2373, %v1025_v27  }
 0x89b   :  { %2375 = vset.pattern.permute.xlu1 %v2529_v0 }
 0x89f   :  { %v2461_v9 = vpop.eup %2460 }
 0x8a0   :  { %1072 = vperm.xlu0 %2371, %v2461_v9  }
 0x8a4   :  { %2374 = vset.pattern.permute.xlu0 %v2529_v0 }
 0x90d   :  { %v1079_v12 = vpop.permute.xlu1 %1078 }
 0x912   :  { %v1050_v17 = vpop.permute.xlu1 %1049 }
 0x913   :  { %v1057_v29 = vmul.f32 %v1055_v32, %v1050_v17 }
 0x915   :  { %v1059_v46 = vsub.f32 %v1025_v27, %v1057_v29 }
 0x91b   :  { %v1073_v13 = vpop.permute.xlu0 %1072 }
 0x91c   :  { %v1075_v31 = vmul.f32 %v1073_v13, %v1066_v26 }
 0x91e   :  { %v1089_v16 = vrot.slane %v1075_v31, %v2942_v24 }
 0x920   :  { %v1090_v45 = vmul.f32 %v1089_v16, %v1079_v12 }
 0x922   :  { %v1092_v43 = vsub.f32 %v1066_v26, %v1090_v45  ;;  %v2970_v26 = vsub.s32 5, %v2919_v4 }
 0x924   :  { %v1100_v18 = vsel %vm1094_vm5, %v1089_v16, %v1092_v43  ;;  %v2533_v43 = vmov 7  }
 0x925   :  { %1112 = vperm.xlu1 %2375, %v1100_v18   ;;  %2462 = vrcp.f32 %v1100_v18 }
 0x929   :  { %2376 = vset.pattern.permute.xlu1 %v2528_v19 }
 0x92a   :  { %1083 = vperm.xlu1 %2376, %v1059_v46  }
 0x92e   :  { %2377 = vset.pattern.permute.xlu1 %v2530_v61 }
 0x932   :  { %v2463_v8 = vpop.eup %2462 }
 0x933   :  { %1106 = vperm.xlu0 %2374, %v2463_v8   ;;  %v2979_v8 = vsub.s32 6, %v2919_v4 }
 0x9a0   :  { %v1113_v62 = vpop.permute.xlu1 %1112 }
 0x9a5   :  { %v1084_v7 = vpop.permute.xlu1 %1083 }
 0x9a6   :  { %v1091_v15 = vmul.f32 %v1089_v16, %v1084_v7 }
 0x9a8   :  { %v1093_v47 = vsub.f32 %v1059_v46, %v1091_v15 }
 0x9aa   :  { %1117 = vperm.xlu0 %2374, %v1093_v47  }
 0x9ae   :  { %v1107_v50 = vpop.permute.xlu0 %1106  ;;  %2378 = vset.pattern.permute.xlu0 %v2530_v61 }
 0x9af   :  { %v1109_v48 = vmul.f32 %v1107_v50, %v1100_v18 }
 0x9b1   :  { %v1123_v49 = vrot.slane %v1109_v48, %v2951_v53 }
 0x9b3   :  { %v1124_v52 = vmul.f32 %v1123_v49, %v1113_v62 }
 0x9b5   :  { %v1126_v54 = vsub.f32 %v1100_v18, %v1124_v52 }
 0x9b7   :  { %v1134_v56 = vsel %vm1128_vm6, %v1123_v49, %v1126_v54 }
 0x9b8   :  { %2464 = vrcp.f32 %v1134_v56  ;;  %1146 = vperm.xlu0 %2378, %v1134_v56  }
 0x9bc   :  { %2380 = vset.pattern.permute.xlu0 %v2531_v59 }
 0x9c5   :  { %v2465_v57 = vpop.eup %2464 }
 0x9c6   :  { %1140 = vperm.xlu1 %2377, %v2465_v57  }
 0xa25   :  { %v1118_v2 = vpop.permute.xlu0 %1117 }
 0xa26   :  { %v1125_v3 = vmul.f32 %v1123_v49, %v1118_v2  ;;  %v2534_v2 = vmov 8  }
 0xa28   :  { %v1127_v63 = vsub.f32 %v1093_v47, %v1125_v3 }
 0xa2a   :  { %1151 = vperm.xlu1 %2377, %v1127_v63  }
 0xa2e   :  { %2379 = vset.pattern.permute.xlu1 %v2531_v59 }
 0xa33   :  { %v1147_v14 = vpop.permute.xlu0 %1146 }
 0xa41   :  { %v1141_v6 = vpop.permute.xlu1 %1140 }
 0xa42   :  { %v1143_v10 = vmul.f32 %v1141_v6, %v1134_v56 }
 0xa44   :  { %v1157_v11 = vrot.slane %v1143_v10, %v2961_v1 }
 0xa46   :  { %v1158_v25 = vmul.f32 %v1157_v11, %v1147_v14 }
 0xa48   :  { %v1160_v28 = vsub.f32 %v1134_v56, %v1158_v25 }
 0xa4a   :  { %v1168_v30 = vsel %vm1162_vm7, %v1157_v11, %v1160_v28 }
 0xa4b   :  { %1180 = vperm.xlu0 %2380, %v1168_v30   ;;  %2466 = vrcp.f32 %v1168_v30 }
 0xa4f   :  { %2382 = vset.pattern.permute.xlu0 %v2532_v35 }
 0xa58   :  { %v2467_v32 = vpop.eup %2466 }
 0xa59   :  { %1174 = vperm.xlu1 %2379, %v2467_v32  }
 0xaa5   :  { %v1152_v38 = vpop.permute.xlu1 %1151 }
 0xaa6   :  { %v1159_v40 = vmul.f32 %v1157_v11, %v1152_v38 }
 0xaa8   :  { %v1161_v41 = vsub.f32 %v1127_v63, %v1159_v40  ;;  %v2987_v63 = vsub.s32 7, %v2919_v4  ;;  %v2993_v40 = vadd.s32 8, %v2919_v4 }
 0xaaa   :  { %1185 = vperm.xlu1 %2379, %v1161_v41   ;;  %vm1299_vm11 = vcmp.eq.s32.totalorder %v2993_v40, 8  ;;  %vm1333_vm13 = vcmp.eq.s32.totalorder %v2993_v40, 9  ;;  %vm1367_vm14 = vcmp.eq.s32.totalorder %v2993_v40, 10  ;;  %vm1401_vm15 = vcmp.eq.s32.totalorder %v2993_v40, 11 }
 0xaab   :  { %vm1435_vm0 = vcmp.eq.s32.totalorder %v2993_v40, 12  ;;  %vm1469_vm1 = vcmp.eq.s32.totalorder %v2993_v40, 13  ;;  %vm3173_vm2 = vcmp.eq.s32.totalorder %v2993_v40, 14 }
 0xaae   :  { %2381 = vset.pattern.permute.xlu1 %v2532_v35 }
 0xac6   :  { %v1181_v13 = vpop.permute.xlu0 %1180 }
 0xad4   :  { %v1175_v27 = vpop.permute.xlu1 %1174 }
 0xad5   :  { %v1177_v9 = vmul.f32 %v1175_v27, %v1168_v30 }
 0xad7   :  { %v1191_v12 = vrot.slane %v1177_v9, %v2970_v26 }
 0xad9   :  { %v1192_v31 = vmul.f32 %v1191_v12, %v1181_v13 }
 0xadb   :  { %v1194_v16 = vsub.f32 %v1168_v30, %v1192_v31  ;;  %v2535_v30 = vmov 9  }
 0xadd   :  { %v1202_v45 = vsel %vm1196_vm8, %v1191_v12, %v1194_v16 }
 0xade   :  { %1214 = vperm.xlu0 %2382, %v1202_v45   ;;  %2468 = vrcp.f32 %v1202_v45 }
 0xae2   :  { %2384 = vset.pattern.permute.xlu0 %v2533_v43 }
 0xaeb   :  { %v2469_v17 = vpop.eup %2468 }
 0xaec   :  { %1208 = vperm.xlu1 %2381, %v2469_v17  }
 0xb25   :  { %v1186_v29 = vpop.permute.xlu1 %1185 }
 0xb26   :  { %v1193_v18 = vmul.f32 %v1191_v12, %v1186_v29 }
 0xb28   :  { %v1195_v46 = vsub.f32 %v1161_v41, %v1193_v18  ;;  %v2536_v18 = vmov 10  }
 0xb2a   :  { %1219 = vperm.xlu1 %2381, %v1195_v46  }
 0xb2e   :  { %2383 = vset.pattern.permute.xlu1 %v2533_v43 }
 0xb59   :  { %v1215_v47 = vpop.permute.xlu0 %1214 }
 0xb67   :  { %v1209_v62 = vpop.permute.xlu1 %1208 }
 0xb68   :  { %v1211_v7 = vmul.f32 %v1209_v62, %v1202_v45 }
 0xb6a   :  { %v1225_v15 = vrot.slane %v1211_v7, %v2979_v8 }
 0xb6c   :  { %v1226_v50 = vmul.f32 %v1225_v15, %v1215_v47 }
 0xb6e   :  { %v1228_v48 = vsub.f32 %v1202_v45, %v1226_v50 }
 0xb70   :  { %v1236_v49 = vsel %vm1230_vm10, %v1225_v15, %v1228_v48 }
 0xb71   :  { %2470 = vrcp.f32 %v1236_v49 }
 0xb7e   :  { %v2471_v52 = vpop.eup %2470 }
 0xb7f   :  { %1242 = vperm.xlu1 %2383, %v2471_v52  }
 0xb83   :  { %2385 = vset.pattern.permute.xlu1 %v2534_v2 }
 0xba5   :  { %v1220_v54 = vpop.permute.xlu1 %1219 }
 0xba6   :  { %v1227_v56 = vmul.f32 %v1225_v15, %v1220_v54 }
 0xba8   :  { %v1229_v57 = vsub.f32 %v1195_v46, %v1227_v56 }
 0xbaa   :  { %1253 = vperm.xlu0 %2384, %v1229_v57  }
 0xbae   :  { %1248 = vperm.xlu0 %2384, %v1236_v49  }
 0xbb2   :  { %2387 = vset.pattern.permute.xlu0 %v2535_v30 }
 0xbfa   :  { %v1243_v3 = vpop.permute.xlu1 %1242 }
 0xbfb   :  { %v1245_v6 = vmul.f32 %v1243_v3, %v1236_v49 }
 0xbfd   :  { %v1259_v10 = vrot.slane %v1245_v6, %v2987_v63 }
 0xc25   :  { %v1254_v11 = vpop.permute.xlu0 %1253 }
 0xc26   :  { %v1261_v14 = vmul.f32 %v1259_v10, %v1254_v11 }
 0xc28   :  { %v1263_v25 = vsub.f32 %v1229_v57, %v1261_v14  ;;  %v2537_v57 = vmov 11  }
 0xc29   :  { %v1249_v31 = vpop.permute.xlu0 %1248 }
 0xc2a   :  { %2472 = vrcp.f32 %v1263_v25  ;;  %v1260_v16 = vmul.f32 %v1259_v10, %v1249_v31 }
 0xc2c   :  { %v1262_v17 = vsub.f32 %v1236_v49, %v1260_v16 }
 0xc2e   :  { %v1270_v29 = vsel %vm1264_vm12, %v1259_v10, %v1262_v17 }
 0xc37   :  { %v2473_v28 = vpop.eup %2472 }
 0xc38   :  { %1276 = vperm.xlu1 %2385, %v2473_v28  }
 0xc3c   :  { %1287 = vperm.xlu1 %2385, %v1263_v25  }
 0xc40   :  { %2386 = vset.pattern.permute.xlu1 %v2535_v30 }
 0xcb3   :  { %v1277_v32 = vpop.permute.xlu1 %1276 }
 0xcb4   :  { %v1279_v38 = vmul.f32 %v1277_v32, %v1263_v25 }
 0xcb6   :  { %v1293_v41 = vrot.slane %v1279_v38, %v2922_v60 }
 0xcb7   :  { %v1288_v27 = vpop.permute.xlu1 %1287 }
 0xcb8   :  { %v1295_v9 = vmul.f32 %v1293_v41, %v1288_v27 }
 0xcba   :  { %v1297_v12 = vsub.f32 %v1263_v25, %v1295_v9  ;;  %v2538_v9 = vmov 12  }
 0xcbc   :  { %v1305_v13 = vsel %vm1299_vm11, %v1293_v41, %v1297_v12 }
 0xcbd   :  { %1321 = vperm.xlu0 %2387, %v1305_v13   ;;  %2474 = vrcp.f32 %v1305_v13 }
 0xcc1   :  { %2390 = vset.pattern.permute.xlu0 %v2536_v18 }
 0xcca   :  { %v2475_v45 = vpop.eup %2474 }
 0xccb   :  { %1310 = vperm.xlu1 %2386, %v2475_v45  }
 0xccf   :  { %2388 = vset.pattern.permute.xlu1 %v2534_v2 }
 0xcd0   :  { %1282 = vperm.xlu1 %2388, %v1270_v29  }
 0xcd4   :  { %2389 = vset.pattern.permute.xlu1 %v2536_v18 }
 0xd38   :  { %v1322_v15 = vpop.permute.xlu0 %1321 }
 0xd46   :  { %v1311_v46 = vpop.permute.xlu1 %1310 }
 0xd47   :  { %v1313_v62 = vmul.f32 %v1311_v46, %v1305_v13 }
 0xd49   :  { %v1327_v7 = vrot.slane %v1313_v62, %v2932_v21 }
 0xd4b   :  { %v1329_v47 = vmul.f32 %v1327_v7, %v1322_v15  ;;  %v1283_v49 = vpop.permute.xlu1 %1282 }
 0xd4c   :  { %v1294_v54 = vmul.f32 %v1293_v41, %v1283_v49 }
 0xd4d   :  { %v1331_v50 = vsub.f32 %v1305_v13, %v1329_v47  ;;  %v2539_v47 = vmov 13  }
 0xd4e   :  { %v1296_v56 = vsub.f32 %v1270_v29, %v1294_v54 }
 0xd4f   :  { %v1339_v48 = vsel %vm1333_vm13, %v1327_v7, %v1331_v50 }
 0xd50   :  { %1355 = vperm.xlu0 %2390, %v1339_v48   ;;  %2476 = vrcp.f32 %v1339_v48 }
 0xd54   :  { %2393 = vset.pattern.permute.xlu0 %v2537_v57 }
 0xd5d   :  { %v2477_v52 = vpop.eup %2476 }
 0xd5e   :  { %1344 = vperm.xlu1 %2389, %v2477_v52  }
 0xd62   :  { %2391 = vset.pattern.permute.xlu1 %v2535_v30 }
 0xd63   :  { %1316 = vperm.xlu1 %2391, %v1296_v56  }
 0xd67   :  { %2392 = vset.pattern.permute.xlu1 %v2537_v57 }
 0xdcb   :  { %v1356_v11 = vpop.permute.xlu0 %1355 }
 0xdd9   :  { %v1345_v3 = vpop.permute.xlu1 %1344 }
 0xdda   :  { %v1347_v6 = vmul.f32 %v1345_v3, %v1339_v48 }
 0xddc   :  { %v1361_v10 = vrot.slane %v1347_v6, %v2942_v24 }
 0xdde   :  { %v1363_v14 = vmul.f32 %v1361_v10, %v1356_v11  ;;  %v1317_v32 = vpop.permute.xlu1 %1316 }
 0xddf   :  { %v1328_v41 = vmul.f32 %v1327_v7, %v1317_v32 }
 0xde0   :  { %v1365_v25 = vsub.f32 %v1339_v48, %v1363_v14 }
 0xde1   :  { %v1330_v27 = vsub.f32 %v1296_v56, %v1328_v41 }
 0xde2   :  { %v1373_v28 = vsel %vm1367_vm14, %v1361_v10, %v1365_v25  ;;  %v2540_v25 = vmov 14  }
 0xde3   :  { %1389 = vperm.xlu0 %2393, %v1373_v28   ;;  %2478 = vrcp.f32 %v1373_v28 }
 0xde7   :  { %2396 = vset.pattern.permute.xlu0 %v2538_v9 }
 0xdf0   :  { %v2479_v38 = vpop.eup %2478 }
 0xdf1   :  { %1378 = vperm.xlu1 %2392, %v2479_v38  }
 0xdf5   :  { %2394 = vset.pattern.permute.xlu1 %v2536_v18 }
 0xdf6   :  { %1350 = vperm.xlu1 %2394, %v1330_v27  }
 0xdfa   :  { %2395 = vset.pattern.permute.xlu1 %v2537_v57 }
 0xe5e   :  { %v1390_v16 = vpop.permute.xlu0 %1389 }
 0xe6c   :  { %v1379_v12 = vpop.permute.xlu1 %1378 }
 0xe6d   :  { %v1381_v13 = vmul.f32 %v1379_v12, %v1373_v28 }
 0xe6f   :  { %v1395_v31 = vrot.slane %v1381_v13, %v2951_v53 }
 0xe71   :  { %v1397_v45 = vmul.f32 %v1395_v31, %v1390_v16  ;;  %v1351_v17 = vpop.permute.xlu1 %1350 }
 0xe72   :  { %v1362_v29 = vmul.f32 %v1361_v10, %v1351_v17 }
 0xe73   :  { %v1399_v46 = vsub.f32 %v1373_v28, %v1397_v45 }
 0xe74   :  { %v1364_v62 = vsub.f32 %v1330_v27, %v1362_v29  ;;  %v2541_v29 = vmov 15  }
 0xe75   :  { %v1407_v7 = vsel %vm1401_vm15, %v1395_v31, %v1399_v46 }
 0xe76   :  { %1384 = vperm.xlu1 %2395, %v1364_v62   ;;  %2480 = vrcp.f32 %v1407_v7 }
 0xe7a   :  { %2397 = vset.pattern.permute.xlu1 %v2538_v9 }
 0xe7b   :  { %1423 = vperm.xlu1 %2397, %v1407_v7  }
 0xe83   :  { %v2481_v15 = vpop.eup %2480 }
 0xe84   :  { %1412 = vperm.xlu0 %2396, %v2481_v15  }
 0xe88   :  { %2398 = vset.pattern.permute.xlu0 %v2539_v47 }
 0xef1   :  { %v1385_v50 = vpop.permute.xlu1 %1384 }
 0xef2   :  { %v1396_v48 = vmul.f32 %v1395_v31, %v1385_v50 }
 0xef4   :  { %v1398_v49 = vsub.f32 %v1364_v62, %v1396_v48 }
 0xef6   :  { %1418 = vperm.xlu1 %2397, %v1398_v49   ;;  %v1424_v3 = vpop.permute.xlu1 %1423 }
 0xefa   :  { %2399 = vset.pattern.permute.xlu1 %v2539_v47 }
 0xeff   :  { %v1413_v52 = vpop.permute.xlu0 %1412 }
 0xf00   :  { %v1415_v54 = vmul.f32 %v1413_v52, %v1407_v7 }
 0xf02   :  { %v1429_v56 = vrot.slane %v1415_v54, %v2961_v1 }
 0xf04   :  { %v1431_v6 = vmul.f32 %v1429_v56, %v1424_v3 }
 0xf06   :  { %v1433_v10 = vsub.f32 %v1407_v7, %v1431_v6 }
 0xf08   :  { %v1441_v11 = vsel %vm1435_vm0, %v1429_v56, %v1433_v10 }
 0xf09   :  { %1457 = vperm.xlu1 %2399, %v1441_v11   ;;  %2482 = vrcp.f32 %v1441_v11 }
 0xf16   :  { %v2483_v14 = vpop.eup %2482 }
 0xf17   :  { %1446 = vperm.xlu0 %2398, %v2483_v14  }
 0xf1b   :  { %2400 = vset.pattern.permute.xlu0 %v2540_v25 }
 0xf71   :  { %v1419_v28 = vpop.permute.xlu1 %1418 }
 0xf72   :  { %v1430_v32 = vmul.f32 %v1429_v56, %v1419_v28 }
 0xf74   :  { %v1432_v38 = vsub.f32 %v1398_v49, %v1430_v32 }
 0xf76   :  { %1452 = vperm.xlu1 %2399, %v1432_v38  }
 0xf7a   :  { %2401 = vset.pattern.permute.xlu1 %v2540_v25 }
 0xf84   :  { %v1458_v13 = vpop.permute.xlu1 %1457 }
 0xf92   :  { %v1447_v41 = vpop.permute.xlu0 %1446 }
 0xf93   :  { %v1449_v27 = vmul.f32 %v1447_v41, %v1441_v11 }
 0xf95   :  { %v1463_v12 = vrot.slane %v1449_v27, %v2970_v26 }
 0xf97   :  { %v1465_v31 = vmul.f32 %v1463_v12, %v1458_v13 }
 0xf99   :  { %v1467_v16 = vsub.f32 %v1441_v11, %v1465_v31 }
 0xf9b   :  { %v1475_v45 = vsel %vm1469_vm1, %v1463_v12, %v1467_v16 }
 0xf9c   :  { %1491 = vperm.xlu1 %2401, %v1475_v45   ;;  %2484 = vrcp.f32 %v1475_v45 }
 0xfa9   :  { %v2485_v17 = vpop.eup %2484 }
 0xfaa   :  { %1480 = vperm.xlu0 %2400, %v2485_v17   ;;  %v876_v17 = vmul.f32 %v2891_v33, %v2859_v36 }
 0xfae   :  { %2402 = vset.pattern.permute.xlu0 %v2541_v29 }
 0xff1   :  { %v1453_v46 = vpop.permute.xlu1 %1452 }
 0xff2   :  { %v1464_v62 = vmul.f32 %v1463_v12, %v1453_v46 }
 0xff4   :  { %v1466_v7 = vsub.f32 %v1432_v38, %v1464_v62  ;;  %v894_v62 = vadd.f32 %v2897_v39, %v876_v17 }
 0xff6   :  { %1486 = vperm.xlu1 %2401, %v1466_v7  }
 0xffa   :  { %2403 = vset.pattern.permute.xlu1 %v2541_v29 }
0x1017   :  { %v1492_v49 = vpop.permute.xlu1 %1491 }
0x1025   :  { %v1481_v15 = vpop.permute.xlu0 %1480 }
0x1026   :  { %v1483_v50 = vmul.f32 %v1481_v15, %v1475_v45  ;;  %v902_v15 = vadd.f32 %v894_v62, %v2722_v44 }
0x1028   :  { %v1497_v48 = vrot.slane %v1483_v50, %v2979_v8  ;;  %v871_v50 = vmul.f32 %v2901_v20, %v2861_v37 }
0x102a   :  { %v1499_v52 = vmul.f32 %v1497_v48, %v1492_v49 }
0x102c   :  { %v1501_v54 = vsub.f32 %v1475_v45, %v1499_v52  ;;  %v875_v45 = vmul.f32 %v2891_v33, %v2845_v23  ;;  %v1666_v52 = vand.u32 2147483647, %v902_v15  ;;  %v889_v23 = vadd.f32 %v2909_v34, %v871_v50 }
0x102e   :  { %v1509_v56 = vsel %vm3173_vm2, %v1497_v48, %v1501_v54  ;;  %vm1537_vm2 = vcmp.eq.s32.totalorder %v2993_v40, 15  ;;  %v893_v46 = vadd.f32 %v2897_v39, %v875_v45  ;;  %v897_v39 = vadd.f32 %v889_v23, %v2744_v55 }
0x102f   :  { %2486 = vrcp.f32 %v1509_v56 }
0x1030   :  { %v1663_v54 = vand.u32 2147483647, %v897_v39 }
0x103c   :  { %v2487_v3 = vpop.eup %2486 }
0x103d   :  { %1514 = vperm.xlu0 %2402, %v2487_v3  }
0x1071   :  { %v1487_v6 = vpop.permute.xlu1 %1486 }
0x1072   :  { %v1498_v10 = vmul.f32 %v1497_v48, %v1487_v6  ;;  %v872_v48 = vmul.f32 %v2901_v20, %v2874_v42 }
0x1074   :  { %v1500_v11 = vsub.f32 %v1466_v7, %v1498_v10  ;;  %v901_v7 = vadd.f32 %v893_v46, %v2728_v22  ;;  %v890_v36 = vadd.f32 %v2909_v34, %v872_v48 }
0x1076   :  { %1520 = vperm.xlu1 %2403, %v1500_v11   ;;  %v1665_v49 = vand.u32 2147483647, %v901_v7  ;;  %v898_v22 = vadd.f32 %v890_v36, %v2734_v51 }
0x1078   :  { %v1670_v33 = vadd.f32 %v1666_v52, %v1665_v49  ;;  %v1664_v44 = vand.u32 2147483647, %v898_v22 }
0x107a   :  { %1525 = vperm.xlu1 %2403, %v1509_v56  }
0x107e   :  { %2404 = vset.pattern.permute.xlu1 %v2526_v5 }
0x10b8   :  { %v1515_v14 = vpop.permute.xlu0 %1514 }
0x10b9   :  { %v1517_v28 = vmul.f32 %v1515_v14, %v1509_v56 }
0x10bb   :  { %v1531_v32 = vrot.slane %v1517_v28, %v2987_v63 }
0x10f1   :  { %v1521_v38 = vpop.permute.xlu1 %1520 }
0x10f2   :  { %v1532_v41 = vmul.f32 %v1531_v32, %v1521_v38  ;;  %v2524_v38 = vld [vmem:[%s3159_s0 + $0x8] sm:$0xff] }
0x10f4   :  { %v1534_v27 = vsub.f32 %v1500_v11, %v1532_v41 }
0x10f5   :  { %v1526_v12 = vpop.permute.xlu1 %1525 }
0x10f6   :  { %v1533_v13 = vmul.f32 %v1531_v32, %v1526_v12  ;;  %1546 = vrot.lane.b32.xlu0 %v1534_v27, %s2542_s11 }
0x10f8   :  { %v1535_v31 = vsub.f32 %v1509_v56, %v1533_v13  ;;  %v1667_v56 = vadd.f32 %v1664_v44, %v1663_v54 }
0x10fa   :  { %v1543_v16 = vsel %vm1537_vm2, %v1531_v32, %v1535_v31 }
0x10fb   :  { %1548 = vrot.lane.b32.xlu1 %v1543_v16, %s2542_s11 }
0x1115   :  { %1671 = vadd.xlane.f32.xlu0 %v1670_v33 }
0x111f   :  { %1668 = vadd.xlane.f32.xlu1 %v1667_v56 }
0x1168   :  { %v1547_v37 = vpop.permute.xlu0 %1546 }
0x1169   :  { %1552 = vxpose.xlu0.b32.start [1/2] (short) (narrow) %v1547_v37, 8 }
0x116d   :  { %v1549_v3 = vpop.permute.xlu1 %1548 }
0x116e   :  { %1553 = vxpose.xlu0.b32.end [2/2] (short) (narrow) %v1549_v3, 8 }
0x1197   :  { %2409 = vset.pattern.permute.xlu0 %v2529_v0 }
0x119e   :  { %v1672_v42 = vpop.xlane.xlu0 %1671 }
0x119f   :  { %v1674_v20 = vadd.f32 1e-06, %v1672_v42 }
0x11a1   :  { %2488 = vrcp.f32 %v1674_v20 }
0x11a8   :  { %v1669_v34 = vpop.xlane.xlu1 %1668 }
0x11a9   :  { %v1673_v6 = vadd.f32 1e-06, %v1669_v34 }
0x11ab   :  { %2490 = vrcp.f32 %v1673_v6 }
0x11ae   :  { %v2489_v10 = vpop.eup %2488 }
0x11af   :  { %v1680_v55 = vmul.f32 %v2489_v10, %v902_v15  ;;  %v1679_v11 = vmul.f32 %v2489_v10, %v901_v7 }
0x11b1   :  { %2276 = vmatprep.subr.mxu0 %v1680_v55 }
0x11b2   :  { %2277 = vmatpush1.msra.mxu0 %v1679_v11 }
0x11b8   :  { %v2491_v51 = vpop.eup %2490 }
0x11b9   :  { %v1678_v14 = vmul.f32 %v2491_v51, %v898_v22  ;;  %v1677_v28 = vmul.f32 %v2491_v51, %v897_v39 }
0x11bb   :  { %2278 = vmatprep.subr.mxu0 %v1678_v14 }
0x11bc   :  { %2279 = vmatpush1.msra.mxu0 %v1677_v28 }
0x11e6   :  { %v1568_v32 = vpop.trf.xlu0 }
0x11e7   :  { %2345 = vmatmul.mubr.msk.f32.vlgmr.msra.gmra.mxu1 %vm360_vm9, %v1568_v32 }
0x11e8   :  { %1709 = vmatpush1.xpose.msra.mxu1 %v2524_v38  ;;  %1746 = vmatprep.mubr.f32.mxu1 %v1678_v14 }
0x11e9   :  { %1710 = vmatprep.subr.mxu1 %v1680_v55 }
0x11ec   :  { %1711 = vmatpush1.xpose.msra.mxu1 %v1679_v11 }
0x11ed   :  { %1712 = vmatprep.subr.mxu1 %v1678_v14 }
0x11f0   :  { %1713 = vmatpush1.xpose.msra.mxu1 %v1677_v28 }
0x11f3   :  { %1747 = vmatmul.mubr.f32.vlgmr.msra.gmra.mxu1 %v1677_v28 }
0x11f4   :  { %1751 = vmatprep.mubr.f32.mxu1 %v1680_v55 }
0x11f7   :  { %1752 = vmatmul.mubr.f32.gmra.mxu1 %v1679_v11 }
0x12a7   :  { %v1653_v41 = vpop.f32.mrf.mxu1 }
0x12a9   :  { %v1655_v27 = vpop.f32.mrf.mxu1 }
0x12aa   :  { %v1660_v12 = vcombine.low %v1653_v41, %v1655_v27 }
0x12ac   :  { %1662 = vst [vmem:[%s3172_s13] sm:$0xff] %v1660_v12 }
0x12b3   :  { %v1748_v13 = vpop.f32.mrf.mxu1 }
0x12b4   :  { %2492 = vrcp.f32 %v1748_v13 }
0x12b5   :  { %v1750_v31 = vpop.f32.mrf.mxu1 }
0x12b7   :  { %v1753_v16 = vpop.f32.mrf.mxu1 }
0x12b9   :  { %v1755_v45 = vpop.f32.mrf.mxu1 }
0x12c1   :  { %v2493_v17 = vpop.eup %2492 }
0x12c2   :  { %1761 = vperm.xlu1 %2404, %v2493_v17  }
0x12c6   :  { %1767 = vperm.xlu1 %2404, %v1748_v13  }
0x12ca   :  { %2405 = vset.pattern.permute.xlu1 %v2527_v58 }
0x133d   :  { %v1762_v46 = vpop.permute.xlu1 %1761 }
0x133e   :  { %v1764_v62 = vmul.f32 %v1762_v46, %v1748_v13 }
0x1340   :  { %v1778_v7 = vrot.slane %v1764_v62, %v2922_v60 }
0x1341   :  { %v1768_v15 = vpop.permute.xlu1 %1767 }
0x1342   :  { %v1779_v50 = vmul.f32 %v1778_v7, %v1768_v15 }
0x1344   :  { %v1781_v48 = vsub.f32 %v1748_v13, %v1779_v50 }
0x1346   :  { %v1783_v49 = vsel %vm1026_vm3, %v1778_v7, %v1781_v48  ;;  %vm3174_vm3 = vcmp.eq.s32.totalorder %v2993_v40, 14 }
0x1347   :  { %2494 = vrcp.f32 %v1783_v49 }
0x1354   :  { %v2495_v52 = vpop.eup %2494 }
0x1355   :  { %1789 = vperm.xlu1 %2405, %v2495_v52  }
0x1359   :  { %1795 = vperm.xlu1 %2405, %v1783_v49  }
0x135d   :  { %2406 = vset.pattern.permute.xlu1 %v2526_v5 }
0x135e   :  { %1772 = vperm.xlu1 %2406, %v1753_v16  }
0x1362   :  { %2407 = vset.pattern.permute.xlu1 %v2528_v19 }
0x13d0   :  { %v1790_v23 = vpop.permute.xlu1 %1789 }
0x13d1   :  { %v1792_v36 = vmul.f32 %v1790_v23, %v1783_v49 }
0x13d3   :  { %v1806_v33 = vrot.slane %v1792_v36, %v2932_v21 }
0x13d4   :  { %v1796_v39 = vpop.permute.xlu1 %1795 }
0x13d5   :  { %v1807_v22 = vmul.f32 %v1806_v33, %v1796_v39 }
0x13d7   :  { %v1809_v54 = vsub.f32 %v1783_v49, %v1807_v22 }
0x13d9   :  { %v1811_v44 = vsel %vm1060_vm4, %v1806_v33, %v1809_v54  ;;  %v1773_v37 = vpop.permute.xlu1 %1772 }
0x13da   :  { %2496 = vrcp.f32 %v1811_v44  ;;  %v1780_v3 = vmul.f32 %v1778_v7, %v1773_v37 }
0x13dc   :  { %v1782_v5 = vsub.f32 %v1753_v16, %v1780_v3 }
0x13e7   :  { %v2497_v56 = vpop.eup %2496 }
0x13e8   :  { %1817 = vperm.xlu1 %2407, %v2497_v56  }
0x13ec   :  { %1823 = vperm.xlu1 %2407, %v1811_v44  }
0x13f0   :  { %2408 = vset.pattern.permute.xlu1 %v2527_v58 }
0x13f1   :  { %1800 = vperm.xlu1 %2408, %v1782_v5  }
0x13f5   :  { %2410 = vset.pattern.permute.xlu1 %v2529_v0 }
0x1463   :  { %v1818_v42 = vpop.permute.xlu1 %1817 }
0x1464   :  { %v1820_v20 = vmul.f32 %v1818_v42, %v1811_v44 }
0x1466   :  { %v1834_v34 = vrot.slane %v1820_v20, %v2942_v24 }
0x1467   :  { %v1824_v6 = vpop.permute.xlu1 %1823 }
0x1468   :  { %v1835_v10 = vmul.f32 %v1834_v34, %v1824_v6 }
0x146a   :  { %v1837_v55 = vsub.f32 %v1811_v44, %v1835_v10 }
0x146c   :  { %v1801_v11 = vpop.permute.xlu1 %1800  ;;  %v1839_v51 = vsel %vm1094_vm5, %v1834_v34, %v1837_v55 }
0x146d   :  { %v1808_v14 = vmul.f32 %v1806_v33, %v1801_v11  ;;  %1851 = vperm.xlu1 %2410, %v1839_v51   ;;  %2498 = vrcp.f32 %v1839_v51 }
0x146f   :  { %v1810_v28 = vsub.f32 %v1782_v5, %v1808_v14 }
0x1471   :  { %2411 = vset.pattern.permute.xlu1 %v2528_v19 }
0x1472   :  { %1828 = vperm.xlu1 %2411, %v1810_v28  }
0x1476   :  { %2412 = vset.pattern.permute.xlu1 %v2529_v0 }
0x147a   :  { %v2499_v58 = vpop.eup %2498 }
0x147b   :  { %1845 = vperm.xlu0 %2409, %v2499_v58  }
0x147f   :  { %2416 = vset.pattern.permute.xlu0 %v2532_v35 }
0x14e8   :  { %v1852_v32 = vpop.permute.xlu1 %1851 }
0x14ed   :  { %v1829_v38 = vpop.permute.xlu1 %1828 }
0x14ee   :  { %v1836_v41 = vmul.f32 %v1834_v34, %v1829_v38 }
0x14f0   :  { %v1838_v27 = vsub.f32 %v1810_v28, %v1836_v41 }
0x14f2   :  { %1856 = vperm.xlu1 %2412, %v1838_v27  }
0x14f6   :  { %v1846_v12 = vpop.permute.xlu0 %1845  ;;  %2413 = vset.pattern.permute.xlu1 %v2530_v61 }
0x14f7   :  { %v1848_v13 = vmul.f32 %v1846_v12, %v1839_v51 }
0x14f9   :  { %v1862_v31 = vrot.slane %v1848_v13, %v2951_v53 }
0x14fb   :  { %v1863_v16 = vmul.f32 %v1862_v31, %v1852_v32 }
0x14fd   :  { %v1865_v19 = vsub.f32 %v1839_v51, %v1863_v16 }
0x14ff   :  { %v1867_v0 = vsel %vm1128_vm6, %v1862_v31, %v1865_v19 }
0x1500   :  { %2500 = vrcp.f32 %v1867_v0 }
0x150d   :  { %v2501_v45 = vpop.eup %2500 }
0x150e   :  { %1873 = vperm.xlu1 %2413, %v2501_v45  }
0x1512   :  { %1879 = vperm.xlu1 %2413, %v1867_v0  }
0x156d   :  { %v1857_v17 = vpop.permute.xlu1 %1856 }
0x156e   :  { %v1864_v46 = vmul.f32 %v1862_v31, %v1857_v17 }
0x1570   :  { %v1866_v62 = vsub.f32 %v1838_v27, %v1864_v46 }
0x1572   :  { %1884 = vperm.xlu1 %2413, %v1866_v62  }
0x1576   :  { %2414 = vset.pattern.permute.xlu1 %v2531_v59 }
0x1589   :  { %v1874_v7 = vpop.permute.xlu1 %1873 }
0x158a   :  { %v1876_v61 = vmul.f32 %v1874_v7, %v1867_v0 }
0x158c   :  { %v1890_v15 = vrot.slane %v1876_v61, %v2961_v1 }
0x158d   :  { %v1880_v50 = vpop.permute.xlu1 %1879 }
0x158e   :  { %v1891_v48 = vmul.f32 %v1890_v15, %v1880_v50 }
0x1590   :  { %v1893_v49 = vsub.f32 %v1867_v0, %v1891_v48 }
0x1592   :  { %v1895_v52 = vsel %vm1162_vm7, %v1890_v15, %v1893_v49 }
0x1593   :  { %2502 = vrcp.f32 %v1895_v52 }
0x15a0   :  { %v2503_v23 = vpop.eup %2502 }
0x15a1   :  { %1901 = vperm.xlu1 %2414, %v2503_v23  }
0x15a5   :  { %1907 = vperm.xlu1 %2414, %v1895_v52  }
0x15ed   :  { %v1885_v36 = vpop.permute.xlu1 %1884 }
0x15ee   :  { %v1892_v33 = vmul.f32 %v1890_v15, %v1885_v36 }
0x15f0   :  { %v1894_v39 = vsub.f32 %v1866_v62, %v1892_v33 }
0x15f2   :  { %1912 = vperm.xlu1 %2414, %v1894_v39  }
0x15f6   :  { %2415 = vset.pattern.permute.xlu1 %v2532_v35 }
0x161c   :  { %v1902_v59 = vpop.permute.xlu1 %1901 }
0x161d   :  { %v1904_v22 = vmul.f32 %v1902_v59, %v1895_v52 }
0x161f   :  { %v1918_v54 = vrot.slane %v1904_v22, %v2970_v26 }
0x1620   :  { %v1908_v44 = vpop.permute.xlu1 %1907 }
0x1621   :  { %v1919_v56 = vmul.f32 %v1918_v54, %v1908_v44 }
0x1623   :  { %v1921_v37 = vsub.f32 %v1895_v52, %v1919_v56 }
0x1625   :  { %v1923_v3 = vsel %vm1196_vm8, %v1918_v54, %v1921_v37 }
0x1626   :  { %1935 = vperm.xlu0 %2416, %v1923_v3   ;;  %2504 = vrcp.f32 %v1923_v3 }
0x162a   :  { %2418 = vset.pattern.permute.xlu0 %v2533_v43 }
0x1633   :  { %v2505_v5 = vpop.eup %2504 }
0x1634   :  { %1929 = vperm.xlu1 %2415, %v2505_v5  }
0x166d   :  { %v1913_v42 = vpop.permute.xlu1 %1912 }
0x166e   :  { %v1920_v20 = vmul.f32 %v1918_v54, %v1913_v42 }
0x1670   :  { %v1922_v34 = vsub.f32 %v1894_v39, %v1920_v20 }
0x1672   :  { %1940 = vperm.xlu1 %2415, %v1922_v34  }
0x1676   :  { %2417 = vset.pattern.permute.xlu1 %v2533_v43 }
0x16a1   :  { %v1936_v55 = vpop.permute.xlu0 %1935 }
0x16af   :  { %v1930_v35 = vpop.permute.xlu1 %1929 }
0x16b0   :  { %v1932_v6 = vmul.f32 %v1930_v35, %v1923_v3 }
0x16b2   :  { %v1946_v10 = vrot.slane %v1932_v6, %v2979_v8 }
0x16b4   :  { %v1947_v11 = vmul.f32 %v1946_v10, %v1936_v55 }
0x16b6   :  { %v1949_v51 = vsub.f32 %v1923_v3, %v1947_v11 }
0x16b8   :  { %v1951_v14 = vsel %vm1230_vm10, %v1946_v10, %v1949_v51 }
0x16b9   :  { %2506 = vrcp.f32 %v1951_v14 }
0x16c6   :  { %v2507_v28 = vpop.eup %2506 }
0x16c7   :  { %1957 = vperm.xlu1 %2417, %v2507_v28  }
0x16cb   :  { %2419 = vset.pattern.permute.xlu1 %v2534_v2 }
0x16ed   :  { %v1941_v58 = vpop.permute.xlu1 %1940 }
0x16ee   :  { %v1948_v32 = vmul.f32 %v1946_v10, %v1941_v58 }
0x16f0   :  { %v1950_v38 = vsub.f32 %v1922_v34, %v1948_v32 }
0x16f2   :  { %1968 = vperm.xlu0 %2418, %v1950_v38  }
0x16f6   :  { %1963 = vperm.xlu0 %2418, %v1951_v14  }
0x16fa   :  { %2421 = vset.pattern.permute.xlu0 %v2535_v30 }
0x1742   :  { %v1958_v43 = vpop.permute.xlu1 %1957 }
0x1743   :  { %v1960_v41 = vmul.f32 %v1958_v43, %v1951_v14 }
0x1745   :  { %v1974_v27 = vrot.slane %v1960_v41, %v2987_v63 }
0x176d   :  { %v1969_v12 = vpop.permute.xlu0 %1968 }
0x176e   :  { %v1976_v13 = vmul.f32 %v1974_v27, %v1969_v12 }
0x1770   :  { %v1978_v31 = vsub.f32 %v1950_v38, %v1976_v13 }
0x1771   :  { %v1964_v61 = vpop.permute.xlu0 %1963 }
0x1772   :  { %2508 = vrcp.f32 %v1978_v31  ;;  %v1975_v15 = vmul.f32 %v1974_v27, %v1964_v61 }
0x1774   :  { %v1977_v48 = vsub.f32 %v1951_v14, %v1975_v15 }
0x177f   :  { %v2509_v16 = vpop.eup %2508 }
0x1780   :  { %1985 = vperm.xlu1 %2419, %v2509_v16  }
0x1784   :  { %1996 = vperm.xlu1 %2419, %v1978_v31  }
0x1788   :  { %2420 = vset.pattern.permute.xlu1 %v2535_v30 }
0x17fb   :  { %v1986_v19 = vpop.permute.xlu1 %1985 }
0x17fc   :  { %v1988_v0 = vmul.f32 %v1986_v19, %v1978_v31 }
0x17fe   :  { %v2002_v45 = vrot.slane %v1988_v0, %v2922_v60  ;;  %v1979_v60 = vsel %vm1264_vm12, %v1974_v27, %v1977_v48 }
0x17ff   :  { %v1997_v17 = vpop.permute.xlu1 %1996 }
0x1800   :  { %v2004_v46 = vmul.f32 %v2002_v45, %v1997_v17 }
0x1802   :  { %v2006_v62 = vsub.f32 %v1978_v31, %v2004_v46 }
0x1804   :  { %v2008_v7 = vsel %vm1299_vm11, %v2002_v45, %v2006_v62 }
0x1805   :  { %2024 = vperm.xlu0 %2421, %v2008_v7   ;;  %2510 = vrcp.f32 %v2008_v7 }
0x1809   :  { %2424 = vset.pattern.permute.xlu0 %v2536_v18 }
0x1812   :  { %v2511_v50 = vpop.eup %2510 }
0x1813   :  { %2013 = vperm.xlu1 %2420, %v2511_v50  }
0x1817   :  { %2422 = vset.pattern.permute.xlu1 %v2534_v2 }
0x1818   :  { %1991 = vperm.xlu1 %2422, %v1979_v60  }
0x181c   :  { %2423 = vset.pattern.permute.xlu1 %v2536_v18 }
0x1880   :  { %v2025_v36 = vpop.permute.xlu0 %2024 }
0x188e   :  { %v2014_v49 = vpop.permute.xlu1 %2013 }
0x188f   :  { %v2016_v52 = vmul.f32 %v2014_v49, %v2008_v7 }
0x1891   :  { %v2030_v23 = vrot.slane %v2016_v52, %v2932_v21 }
0x1893   :  { %v2032_v33 = vmul.f32 %v2030_v23, %v2025_v36  ;;  %v1992_v2 = vpop.permute.xlu1 %1991 }
0x1894   :  { %v2003_v22 = vmul.f32 %v2002_v45, %v1992_v2 }
0x1895   :  { %v2034_v39 = vsub.f32 %v2008_v7, %v2032_v33 }
0x1896   :  { %v2005_v54 = vsub.f32 %v1979_v60, %v2003_v22 }
0x1897   :  { %v2036_v59 = vsel %vm1333_vm13, %v2030_v23, %v2034_v39 }
0x1898   :  { %2052 = vperm.xlu0 %2424, %v2036_v59   ;;  %2512 = vrcp.f32 %v2036_v59 }
0x189c   :  { %2427 = vset.pattern.permute.xlu0 %v2537_v57 }
0x18a5   :  { %v2513_v4 = vpop.eup %2512 }
0x18a6   :  { %2041 = vperm.xlu1 %2423, %v2513_v4  }
0x18aa   :  { %2425 = vset.pattern.permute.xlu1 %v2535_v30 }
0x18ab   :  { %2019 = vperm.xlu1 %2425, %v2005_v54  }
0x18af   :  { %2426 = vset.pattern.permute.xlu1 %v2537_v57 }
0x1913   :  { %v2053_v37 = vpop.permute.xlu0 %2052 }
0x1921   :  { %v2042_v21 = vpop.permute.xlu1 %2041 }
0x1922   :  { %v2044_v44 = vmul.f32 %v2042_v21, %v2036_v59 }
0x1924   :  { %v2058_v56 = vrot.slane %v2044_v44, %v2942_v24 }
0x1926   :  { %v2060_v3 = vmul.f32 %v2058_v56, %v2053_v37  ;;  %v2020_v20 = vpop.permute.xlu1 %2019 }
0x1927   :  { %v2031_v30 = vmul.f32 %v2030_v23, %v2020_v20 }
0x1928   :  { %v2062_v5 = vsub.f32 %v2036_v59, %v2060_v3 }
0x1929   :  { %v2033_v35 = vsub.f32 %v2005_v54, %v2031_v30 }
0x192a   :  { %v2064_v42 = vsel %vm1367_vm14, %v2058_v56, %v2062_v5 }
0x192b   :  { %2080 = vperm.xlu0 %2427, %v2064_v42   ;;  %2514 = vrcp.f32 %v2064_v42 }
0x192f   :  { %2430 = vset.pattern.permute.xlu0 %v2538_v9 }
0x1938   :  { %v2515_v34 = vpop.eup %2514 }
0x1939   :  { %2069 = vperm.xlu1 %2426, %v2515_v34  }
0x193d   :  { %2428 = vset.pattern.permute.xlu1 %v2536_v18 }
0x193e   :  { %2047 = vperm.xlu1 %2428, %v2033_v35  }
0x1942   :  { %2429 = vset.pattern.permute.xlu1 %v2537_v57 }
0x19a6   :  { %v2081_v55 = vpop.permute.xlu0 %2080 }
0x19b4   :  { %v2070_v24 = vpop.permute.xlu1 %2069 }
0x19b5   :  { %v2072_v6 = vmul.f32 %v2070_v24, %v2064_v42 }
0x19b7   :  { %v2086_v10 = vrot.slane %v2072_v6, %v2951_v53 }
0x19b9   :  { %v2088_v11 = vmul.f32 %v2086_v10, %v2081_v55  ;;  %v2048_v51 = vpop.permute.xlu1 %2047 }
0x19ba   :  { %v2059_v14 = vmul.f32 %v2058_v56, %v2048_v51 }
0x19bb   :  { %v2090_v28 = vsub.f32 %v2064_v42, %v2088_v11 }
0x19bc   :  { %v2061_v58 = vsub.f32 %v2033_v35, %v2059_v14 }
0x19bd   :  { %v2092_v32 = vsel %vm1401_vm15, %v2086_v10, %v2090_v28 }
0x19be   :  { %2075 = vperm.xlu1 %2429, %v2061_v58   ;;  %2516 = vrcp.f32 %v2092_v32 }
0x19c2   :  { %2431 = vset.pattern.permute.xlu1 %v2538_v9 }
0x19c3   :  { %2108 = vperm.xlu1 %2431, %v2092_v32  }
0x19cb   :  { %v2517_v18 = vpop.eup %2516 }
0x19cc   :  { %2097 = vperm.xlu0 %2430, %v2517_v18  }
0x19d0   :  { %2432 = vset.pattern.permute.xlu0 %v2539_v47 }
0x1a39   :  { %v2076_v57 = vpop.permute.xlu1 %2075 }
0x1a3a   :  { %v2087_v53 = vmul.f32 %v2086_v10, %v2076_v57 }
0x1a3c   :  { %v2089_v38 = vsub.f32 %v2061_v58, %v2087_v53 }
0x1a3e   :  { %2103 = vperm.xlu1 %2431, %v2089_v38   ;;  %v2109_v12 = vpop.permute.xlu1 %2108 }
0x1a42   :  { %2433 = vset.pattern.permute.xlu1 %v2539_v47 }
0x1a47   :  { %v2098_v43 = vpop.permute.xlu0 %2097 }
0x1a48   :  { %v2100_v41 = vmul.f32 %v2098_v43, %v2092_v32 }
0x1a4a   :  { %v2114_v27 = vrot.slane %v2100_v41, %v2961_v1 }
0x1a4c   :  { %v2116_v13 = vmul.f32 %v2114_v27, %v2109_v12 }
0x1a4e   :  { %v2118_v31 = vsub.f32 %v2092_v32, %v2116_v13 }
0x1a50   :  { %v2120_v9 = vsel %vm1435_vm0, %v2114_v27, %v2118_v31 }
0x1a51   :  { %2136 = vperm.xlu1 %2433, %v2120_v9   ;;  %2518 = vrcp.f32 %v2120_v9 }
0x1a5e   :  { %v2519_v16 = vpop.eup %2518 }
0x1a5f   :  { %2125 = vperm.xlu0 %2432, %v2519_v16  }
0x1a63   :  { %2434 = vset.pattern.permute.xlu0 %v2540_v25 }
0x1ab9   :  { %v2104_v19 = vpop.permute.xlu1 %2103 }
0x1aba   :  { %v2115_v0 = vmul.f32 %v2114_v27, %v2104_v19 }
0x1abc   :  { %v2117_v45 = vsub.f32 %v2089_v38, %v2115_v0 }
0x1abe   :  { %2131 = vperm.xlu1 %2433, %v2117_v45  }
0x1ac2   :  { %2435 = vset.pattern.permute.xlu1 %v2540_v25 }
0x1acc   :  { %v2137_v46 = vpop.permute.xlu1 %2136 }
0x1ada   :  { %v2126_v47 = vpop.permute.xlu0 %2125 }
0x1adb   :  { %v2128_v1 = vmul.f32 %v2126_v47, %v2120_v9 }
0x1add   :  { %v2142_v17 = vrot.slane %v2128_v1, %v2970_v26 }
0x1adf   :  { %v2144_v62 = vmul.f32 %v2142_v17, %v2137_v46 }
0x1ae1   :  { %v2146_v7 = vsub.f32 %v2120_v9, %v2144_v62 }
0x1ae3   :  { %v2148_v61 = vsel %vm1469_vm1, %v2142_v17, %v2146_v7 }
0x1ae4   :  { %2164 = vperm.xlu1 %2435, %v2148_v61   ;;  %2520 = vrcp.f32 %v2148_v61 }
0x1af1   :  { %v2521_v15 = vpop.eup %2520 }
0x1af2   :  { %2153 = vperm.xlu0 %2434, %v2521_v15  }
0x1af6   :  { %2436 = vset.pattern.permute.xlu0 %v2541_v29 }
0x1b39   :  { %v2132_v50 = vpop.permute.xlu1 %2131 }
0x1b3a   :  { %v2143_v48 = vmul.f32 %v2142_v17, %v2132_v50 }
0x1b3c   :  { %v2145_v60 = vsub.f32 %v2117_v45, %v2143_v48 }
0x1b3e   :  { %2159 = vperm.xlu1 %2435, %v2145_v60  }
0x1b42   :  { %2437 = vset.pattern.permute.xlu1 %v2541_v29 }
0x1b5f   :  { %v2165_v52 = vpop.permute.xlu1 %2164 }
0x1b6d   :  { %v2154_v25 = vpop.permute.xlu0 %2153 }
0x1b6e   :  { %v2156_v26 = vmul.f32 %v2154_v25, %v2148_v61 }
0x1b70   :  { %v2170_v49 = vrot.slane %v2156_v26, %v2979_v8 }
0x1b72   :  { %v2172_v23 = vmul.f32 %v2170_v49, %v2165_v52 }
0x1b74   :  { %v2174_v36 = vsub.f32 %v2148_v61, %v2172_v23 }
0x1b76   :  { %v2176_v33 = vsel %vm3174_vm3, %v2170_v49, %v2174_v36 }
0x1b77   :  { %2522 = vrcp.f32 %v2176_v33 }
0x1b84   :  { %v2523_v39 = vpop.eup %2522 }
0x1b85   :  { %2181 = vperm.xlu0 %2436, %v2523_v39  }
0x1bb9   :  { %v2160_v59 = vpop.permute.xlu1 %2159 }
0x1bba   :  { %v2171_v2 = vmul.f32 %v2170_v49, %v2160_v59 }
0x1bbc   :  { %v2173_v4 = vsub.f32 %v2145_v60, %v2171_v2 }
0x1bbe   :  { %2187 = vperm.xlu1 %2437, %v2173_v4  }
0x1bc2   :  { %2192 = vperm.xlu1 %2437, %v2176_v33  }
0x1c00   :  { %v2182_v22 = vpop.permute.xlu0 %2181 }
0x1c01   :  { %v2184_v29 = vmul.f32 %v2182_v22, %v2176_v33 }
0x1c03   :  { %v2198_v54 = vrot.slane %v2184_v29, %v2987_v63 }
0x1c39   :  { %v2188_v21 = vpop.permute.xlu1 %2187 }
0x1c3a   :  { %v2199_v8 = vmul.f32 %v2198_v54, %v2188_v21 }
0x1c3c   :  { %v2201_v44 = vsub.f32 %v2173_v4, %v2199_v8 }
0x1c3d   :  { %v2193_v56 = vpop.permute.xlu1 %2192 }
0x1c3e   :  { %v2200_v37 = vmul.f32 %v2198_v54, %v2193_v56  ;;  %2207 = vrot.lane.b32.xlu0 %v2201_v44, %s2542_s11 }
0x1c40   :  { %v2202_v3 = vsub.f32 %v2176_v33, %v2200_v37 }
0x1c42   :  { %v2204_v5 = vsel %vm1537_vm2, %v2198_v54, %v2202_v3 }
0x1c43   :  { %2209 = vrot.lane.b32.xlu1 %v2204_v5, %s2542_s11 }
0x1cb0   :  { %v2208_v42 = vpop.permute.xlu0 %2207 }
0x1cb1   :  { %2213 = vxpose.xlu0.b32.start [1/2] (short) (narrow) %v2208_v42, 8 }
0x1cb5   :  { %v2210_v20 = vpop.permute.xlu1 %2209 }
0x1cb6   :  { %2214 = vxpose.xlu0.b32.end [2/2] (short) (narrow) %v2210_v20, 8 }
0x1d2e   :  { %v2229_v34 = vpop.trf.xlu0 }
0x1d2f   :  { %2346 = vmatmul.mubr.msk.f32.vlgmr.msra.gmra.mxu0 %vm360_vm9, %v2229_v34 }
0x1def   :  { %v2314_v63 = vpop.f32.mrf.mxu0 }
0x1df1   :  { %v2316_v30 = vpop.f32.mrf.mxu0 }
0x1df2   :  { %v2321_v35 = vcombine.low %v2314_v63, %v2316_v30 }
0x1df4   :  { %2347 = vst [vmem:[%s3172_s13 + $0x8] sm:$0xff] %v2321_v35 }

</bundles_post_ra>
